<compile_context>
chip_gen: v7x
topology: tpu7x:2x2x1
jax: 0.10.0
libtpu: 0.0.40
codegen_flags: <defaults>
</compile_context>

<pallas_src>
import jax
import jax.numpy as jnp
from jax.experimental import pallas as pl
from jax.experimental.pallas import tpu as pltpu


# ----------------------------------------------------------------------------
# Fused Pallas kernel: one grid step == one DBCAttentionLayer (both streams).
# ----------------------------------------------------------------------------
def _dbc_fused_kernel(
        x_sig_ref, x_tem_ref, r_ref, rt_ref, mp_ref, mpt_ref,
        wq_ref, bq_ref, wk_ref, bk_ref, wv_ref, bv_ref, wo_ref, bo_ref,
        wvo_ref, bvo_ref, g1_ref, b1_ref, wff_ref, bff_ref, g2_ref, b2_ref,
        sig_ref, tem_ref):
    # Initialize the resident activation blocks from x at the first layer.
    @pl.when(pl.program_id(0) == 0)
    def _init():
        sig_ref[...] = x_sig_ref[...]
        tem_ref[...] = x_tem_ref[...]

    sig = sig_ref[...]          # (B, D)    f32, resident across the layer grid
    tem = tem_ref[...]          # (B*T, D)  f32, resident across the layer grid
    r = r_ref[...]              # (B*T, B)  constant 0/1 batch selector
    rt = rt_ref[...]            # (B, B*T)

    def mm(x, w, b):
        # Batch-stacked projection: bf16 MXU operands, f32 accumulation.
        return jnp.dot(x.astype(jnp.bfloat16), w,
                       preferred_element_type=jnp.float32) + b

    def layer_norm(x, g, b):
        mu = jnp.mean(x, axis=-1, keepdims=True)
        var = jnp.mean(jnp.square(x - mu), axis=-1, keepdims=True)
        return (x - mu) * jax.lax.rsqrt(var + 1e-5) * g + b

    def addnorm_ffn_act(residual, attn, st):
        # AddNorm1 -> FFN -> AddNorm2 -> SiLU  (dropout = identity, eval mode).
        # The FFN (Linear -> Dropout -> Linear, no activation in between) is a
        # single exact (D, D) linear map; wff/bff hold the pre-fused W2@W1.
        y1 = layer_norm(residual + attn, g1_ref[0, st], b1_ref[0, st])
        ff = mm(y1, wff_ref[0, st], bff_ref[0, st])
        y2 = layer_norm(y1 + ff, g2_ref[0, st], b2_ref[0, st])
        return y2 * jax.nn.sigmoid(y2)

    # ---- signal stream: q = signal (exactly 1 token / batch), k/v = template
    q = mm(sig, wq_ref[0], bq_ref[0])          # (B, D), 1/sqrt(hd) folded in
    k = mm(tem, wk_ref[0], bk_ref[0])          # (B*T, D)
    v = mm(tem, wv_ref[0], bv_ref[0])          # (B*T, D)
    q_rows = jnp.dot(r, q, preferred_element_type=jnp.float32)       # (B*T, D)
    # Per-head logits via the constant 0/1 head-pool matrix -> (B*T, H).
    s = jnp.dot(q_rows * k, mp_ref[...], preferred_element_type=jnp.float32)
    # Column-wise (per-head) constant shift: softmax is invariant to it and it
    # keeps exp() in range.
    s = s - jnp.max(s, axis=0, keepdims=True)
    p = jnp.exp(s)
    denom = jnp.dot(rt, p, preferred_element_type=jnp.float32)        # (B, H)
    p = p * jnp.dot(r, pl.reciprocal(denom, approx=True),
                    preferred_element_type=jnp.float32)
    # Expand head weights back to lanes and take the per-batch weighted sum.
    pe = jnp.dot(p, mpt_ref[...], preferred_element_type=jnp.float32)  # (B*T, D)
    attn_s = jnp.dot(rt, pe * v, preferred_element_type=jnp.float32)   # (B, D)
    attn_s = mm(attn_s, wo_ref[0], bo_ref[0])
    new_sig = addnorm_ffn_act(sig, attn_s, 0)

    # ---- template stream: q = template, k/v = signal (1 key / batch) --------
    # Softmax over a single key is exactly 1, so the attention output for every
    # template position is out_proj(v_proj(signal)); q/k projections cancel
    # exactly.  wvo/bvo hold the pre-fused v_proj + out_proj linear map.
    attn_t = mm(sig, wvo_ref[0], bvo_ref[0])                           # (B, D)
    attn_t = jnp.dot(r, attn_t, preferred_element_type=jnp.float32)    # (B*T, D)
    new_tem = addnorm_ffn_act(tem, attn_t, 1)

    sig_ref[...] = new_sig.astype(sig_ref.dtype)
    tem_ref[...] = new_tem.astype(tem_ref.dtype)


# ----------------------------------------------------------------------------
# Wrapper: packs constants, builds BlockSpecs, launches the fused kernel once.
# ----------------------------------------------------------------------------
def dbc_attention_forward(x, packed, nhead):
    B, S, D = x.shape
    T = S - 1
    assert D % nhead == 0 and T >= 1
    L = packed["wq_s"].shape[0]

    # Lay activations out as 2-D slabs (batch folded into rows) -- free in XLA.
    x_sig = x[:, 0, :]                              # (B, D)
    x_tem = x[:, 1:, :].reshape(B * T, D)           # (B*T, D)

    # Constant selector matrices (exact 0/1).
    hd = D // nhead
    mp = (jnp.arange(D, dtype=jnp.int32)[:, None] // hd
          == jnp.arange(nhead, dtype=jnp.int32)[None, :]).astype(jnp.float32)
    r = (jnp.arange(B * T, dtype=jnp.int32)[:, None] // T
         == jnp.arange(B, dtype=jnp.int32)[None, :]).astype(jnp.float32)

    order = ["wq_s", "bq_s", "wk_s", "bk_s", "wv_s", "bv_s", "wo_s", "bo_s",
             "wvo_t", "bvo_t", "g1", "b1", "wff", "bff", "g2", "b2"]
    ws = [packed[k] for k in order]

    def const_spec(a):
        assert a.ndim == 2
        return pl.BlockSpec(a.shape, lambda l: (0, 0))

    def layer_spec(a):
        inner = tuple(a.shape[1:])
        if a.ndim == 3:
            imap = lambda l: (l, 0, 0)
        else:
            imap = lambda l: (l, 0, 0, 0)
        return pl.BlockSpec((1,) + inner, imap)

    out_sig, out_tem = pl.pallas_call(
        _dbc_fused_kernel,
        out_shape=(jax.ShapeDtypeStruct((B, D), jnp.float32),
                   jax.ShapeDtypeStruct((B * T, D), jnp.float32)),
        grid=(L,),
        in_specs=([const_spec(a) for a in (x_sig, x_tem, r, r.T, mp, mp.T)]
                  + [layer_spec(w) for w in ws]),
        # Constant index_map -> outputs stay resident in VMEM across layers.
        out_specs=(pl.BlockSpec((B, D), lambda l: (0, 0)),
                   pl.BlockSpec((B * T, D), lambda l: (0, 0))),
        compiler_params=pltpu.CompilerParams(
            dimension_semantics=("arbitrary",),
            vmem_limit_bytes=48 * 1024 * 1024),
    )(x_sig, x_tem, r, r.T, mp, mp.T, *ws)

    return jnp.concatenate([out_sig[:, None, :], out_tem.reshape(B, T, D)],
                           axis=1)


# ----------------------------------------------------------------------------
# Parameter construction (synthetic, PyTorch layout) + packing for the kernel.
# ----------------------------------------------------------------------------
def _make_stream_raw(key, d_model, dim_ff):
    ks = jax.random.split(key, 8)
    s = 0.05
    return dict(
        in_w=s * jax.random.normal(ks[0], (3 * d_model, d_model), jnp.float32),
        in_b=s * jax.random.normal(ks[1], (3 * d_model,), jnp.float32),
        out_w=s * jax.random.normal(ks[2], (d_model, d_model), jnp.float32),
        out_b=s * jax.random.normal(ks[3], (d_model,), jnp.float32),
        g1=jnp.ones((d_model,), jnp.float32),
        b1=jnp.zeros((d_model,), jnp.float32),
        w1=s * jax.random.normal(ks[4], (dim_ff, d_model), jnp.float32),
        bf1=s * jax.random.normal(ks[5], (dim_ff,), jnp.float32),
        w2=s * jax.random.normal(ks[6], (d_model, dim_ff), jnp.float32),
        bf2=s * jax.random.normal(ks[7], (d_model,), jnp.float32),
        g2=jnp.ones((d_model,), jnp.float32),
        b2=jnp.zeros((d_model,), jnp.float32),
    )


def pack_params(raw_layers, d_model, nhead):
    """Stack per layer, pre-transpose, fold scale into q, fuse exact linear
    chains (template v+out proj; FFN with no inner activation), cast to bf16."""
    D = d_model
    scale = 1.0 / float(D // nhead) ** 0.5
    f32, bf16 = jnp.float32, jnp.bfloat16

    def stack(fn, dtype):
        return jnp.stack([fn(lp) for lp in raw_layers], axis=0).astype(dtype)

    def both(fn):  # stack the two streams (0 = signal, 1 = template)
        return lambda lp: jnp.stack([fn(lp["signal"]), fn(lp["template"])], 0)

    def ffn_w(sp):   # fused (D, D):  x @ W1^T @ W2^T
        return sp["w1"].T @ sp["w2"].T

    def ffn_b(sp):   # (1, D):  b1 @ W2^T + b2
        return (sp["bf1"] @ sp["w2"].T + sp["bf2"])[None, :]

    return dict(
        # signal-stream cross-attention (q from signal, k/v from template)
        wq_s=stack(lambda lp: lp["signal"]["in_w"][:D].T * scale, bf16),
        bq_s=stack(lambda lp: lp["signal"]["in_b"][:D][None, :] * scale, f32),
        wk_s=stack(lambda lp: lp["signal"]["in_w"][D:2 * D].T, bf16),
        bk_s=stack(lambda lp: lp["signal"]["in_b"][D:2 * D][None, :], f32),
        wv_s=stack(lambda lp: lp["signal"]["in_w"][2 * D:].T, bf16),
        bv_s=stack(lambda lp: lp["signal"]["in_b"][2 * D:][None, :], f32),
        wo_s=stack(lambda lp: lp["signal"]["out_w"].T, bf16),
        bo_s=stack(lambda lp: lp["signal"]["out_b"][None, :], f32),
        # template stream: softmax over a single key == 1, so attention is
        # out_proj(v_proj(signal)); fuse the two (D,D) linears exactly.
        wvo_t=stack(lambda lp: lp["template"]["in_w"][2 * D:].T
                    @ lp["template"]["out_w"].T, bf16),
        bvo_t=stack(lambda lp: (lp["template"]["in_b"][2 * D:]
                    @ lp["template"]["out_w"].T
                    + lp["template"]["out_b"])[None, :], f32),
        # per-stream LayerNorm / fused-FFN weights, stacked on axis 1
        g1=stack(both(lambda sp: sp["g1"][None, :]), f32),
        b1=stack(both(lambda sp: sp["b1"][None, :]), f32),
        wff=stack(both(ffn_w), bf16),
        bff=stack(both(ffn_b), f32),
        g2=stack(both(lambda sp: sp["g2"][None, :]), f32),
        b2=stack(both(lambda sp: sp["b2"][None, :]), f32),
    )


# ----------------------------------------------------------------------------
# Pure-JAX reference (full per-head MHA, unfused FFN, PyTorch-layout weights)
# used to check the fused kernel, with the same bf16-at-matmul-input policy.
# ----------------------------------------------------------------------------
def _q16(a):
    return a.astype(jnp.bfloat16).astype(jnp.float32)


def _ln_ref(x, g, b):
    mu = jnp.mean(x, axis=-1, keepdims=True)
    var = jnp.mean((x - mu) ** 2, axis=-1, keepdims=True)
    return (x - mu) / jnp.sqrt(var + 1e-5) * g + b


def _mha_ref(x_q, x_kv, sp, nhead):
    B, Lq, D = x_q.shape
    Lk = x_kv.shape[1]
    hd = D // nhead
    in_w, in_b = sp["in_w"], sp["in_b"]
    q = _q16(x_q) @ _q16(in_w[:D]).T + in_b[:D]
    k = _q16(x_kv) @ _q16(in_w[D:2 * D]).T + in_b[D:2 * D]
    v = _q16(x_kv) @ _q16(in_w[2 * D:]).T + in_b[2 * D:]
    q = q * (1.0 / float(hd) ** 0.5)
    qh = q.reshape(B, Lq, nhead, hd).transpose(0, 2, 1, 3)
    kh = k.reshape(B, Lk, nhead, hd).transpose(0, 2, 1, 3)
    vh = v.reshape(B, Lk, nhead, hd).transpose(0, 2, 1, 3)
    s = jnp.einsum("bhqe,bhke->bhqk", qh, kh)
    w = jax.nn.softmax(s, axis=-1)
    o = jnp.einsum("bhqk,bhke->bhqe", w, vh)
    o = o.transpose(0, 2, 1, 3).reshape(B, Lq, D)
    return _q16(o) @ _q16(sp["out_w"]).T + sp["out_b"]


def _stream_ref(x_q, x_kv, sp, nhead):
    attn = _mha_ref(x_q, x_kv, sp, nhead)
    y1 = _ln_ref(x_q + attn, sp["g1"], sp["b1"])
    h = _q16(y1) @ _q16(sp["w1"]).T + sp["bf1"]
    ff = _q16(h) @ _q16(sp["w2"]).T + sp["bf2"]
    y2 = _ln_ref(y1 + ff, sp["g2"], sp["b2"])
    return y2 * jax.nn.sigmoid(y2)


def dbc_attention_ref(x, raw_layers, nhead):
    sig, tem = x[:, :1, :], x[:, 1:, :]
    for lp in raw_layers:
        ns = _stream_ref(sig, tem, lp["signal"], nhead)
        nt = _stream_ref(tem, sig, lp["template"], nhead)
        sig, tem = ns, nt
    return jnp.concatenate([sig, tem], axis=1)


# ----------------------------------------------------------------------------
if __name__ == "__main__":
    # Small shapes consistent with the module: x -> (B, S, d_model),
    # signal = x[:, :1, :], template = x[:, 1:, :].
    B, S, D = 2, 9, 32        # d_model scaled down from 512
    NHEAD = 4                 # scaled down from 16     (D % NHEAD == 0)
    DIM_FF = 64               # scaled down from 1024   (= 2 * d_model)
    N_LAYERS = 2              # scaled down from 8

    key = jax.random.PRNGKey(0)
    kx, kp = jax.random.split(key)
    x = jax.random.normal(kx, (B, S, D), jnp.float32)

    raw_layers = []
    for _ in range(N_LAYERS):
        kp, ks, kt = jax.random.split(kp, 3)
        raw_layers.append(dict(signal=_make_stream_raw(ks, D, DIM_FF),
                               template=_make_stream_raw(kt, D, DIM_FF)))

    packed = pack_params(raw_layers, D, NHEAD)

    fwd = jax.jit(dbc_attention_forward, static_argnames=("nhead",))
    out = jax.block_until_ready(fwd(x, packed, nhead=NHEAD))

    ref = dbc_attention_ref(x, raw_layers, NHEAD)
    assert out.shape == (B, S, D), out.shape
    err = float(jnp.max(jnp.abs(out - ref)))
    assert err < 2e-2, f"max abs err {err}"
    print("KERNEL_OK")
</pallas_src>

<mosaic_0001>
module attributes {stable_mosaic.version = 11 : i64} {
  func.func @_dbc_fused_kernel(%arg0: i32, %arg1: memref<2x32xf32, #tpu.memory_space<vmem>>, %arg2: memref<16x32xf32, #tpu.memory_space<vmem>>, %arg3: memref<16x2xf32, #tpu.memory_space<vmem>>, %arg4: memref<2x16xf32, #tpu.memory_space<vmem>>, %arg5: memref<32x4xf32, #tpu.memory_space<vmem>>, %arg6: memref<4x32xf32, #tpu.memory_space<vmem>>, %arg7: memref<1x32x32xbf16, #tpu.memory_space<vmem>>, %arg8: memref<1x1x32xf32, #tpu.memory_space<vmem>>, %arg9: memref<1x32x32xbf16, #tpu.memory_space<vmem>>, %arg10: memref<1x1x32xf32, #tpu.memory_space<vmem>>, %arg11: memref<1x32x32xbf16, #tpu.memory_space<vmem>>, %arg12: memref<1x1x32xf32, #tpu.memory_space<vmem>>, %arg13: memref<1x32x32xbf16, #tpu.memory_space<vmem>>, %arg14: memref<1x1x32xf32, #tpu.memory_space<vmem>>, %arg15: memref<1x32x32xbf16, #tpu.memory_space<vmem>>, %arg16: memref<1x1x32xf32, #tpu.memory_space<vmem>>, %arg17: memref<1x2x1x32xf32, #tpu.memory_space<vmem>>, %arg18: memref<1x2x1x32xf32, #tpu.memory_space<vmem>>, %arg19: memref<1x2x32x32xbf16, #tpu.memory_space<vmem>>, %arg20: memref<1x2x1x32xf32, #tpu.memory_space<vmem>>, %arg21: memref<1x2x1x32xf32, #tpu.memory_space<vmem>>, %arg22: memref<1x2x1x32xf32, #tpu.memory_space<vmem>>, %arg23: memref<2x32xf32, #tpu.memory_space<vmem>>, %arg24: memref<16x32xf32, #tpu.memory_space<vmem>>) attributes {dimension_semantics = [#tpu.dimension_semantics<arbitrary>], iteration_bounds = array<i64: 2>, scalar_prefetch = 0 : i64, scratch_operands = 0 : i64, tpu.core_type = #tpu.core_type<tc>, window_params = [{pipeline_mode = #tpu.pipeline_mode<synchronous>, transform_indices = @transform_0, window_bounds = array<i64: 2, 32>}, {pipeline_mode = #tpu.pipeline_mode<synchronous>, transform_indices = @transform_1, window_bounds = array<i64: 16, 32>}, {pipeline_mode = #tpu.pipeline_mode<synchronous>, transform_indices = @transform_2, window_bounds = array<i64: 16, 2>}, {pipeline_mode = #tpu.pipeline_mode<synchronous>, transform_indices = @transform_3, window_bounds = array<i64: 2, 16>}, {pipeline_mode = #tpu.pipeline_mode<synchronous>, transform_indices = @transform_4, window_bounds = array<i64: 32, 4>}, {pipeline_mode = #tpu.pipeline_mode<synchronous>, transform_indices = @transform_5, window_bounds = array<i64: 4, 32>}, {transform_indices = @transform_6, window_bounds = array<i64: 1, 32, 32>}, {transform_indices = @transform_7, window_bounds = array<i64: 1, 1, 32>}, {transform_indices = @transform_8, window_bounds = array<i64: 1, 32, 32>}, {transform_indices = @transform_9, window_bounds = array<i64: 1, 1, 32>}, {transform_indices = @transform_10, window_bounds = array<i64: 1, 32, 32>}, {transform_indices = @transform_11, window_bounds = array<i64: 1, 1, 32>}, {transform_indices = @transform_12, window_bounds = array<i64: 1, 32, 32>}, {transform_indices = @transform_13, window_bounds = array<i64: 1, 1, 32>}, {transform_indices = @transform_14, window_bounds = array<i64: 1, 32, 32>}, {transform_indices = @transform_15, window_bounds = array<i64: 1, 1, 32>}, {transform_indices = @transform_16, window_bounds = array<i64: 1, 2, 1, 32>}, {transform_indices = @transform_17, window_bounds = array<i64: 1, 2, 1, 32>}, {transform_indices = @transform_18, window_bounds = array<i64: 1, 2, 32, 32>}, {transform_indices = @transform_19, window_bounds = array<i64: 1, 2, 1, 32>}, {transform_indices = @transform_20, window_bounds = array<i64: 1, 2, 1, 32>}, {transform_indices = @transform_21, window_bounds = array<i64: 1, 2, 1, 32>}, {pipeline_mode = #tpu.pipeline_mode<synchronous>, transform_indices = @transform_22, window_bounds = array<i64: 2, 32>}, {pipeline_mode = #tpu.pipeline_mode<synchronous>, transform_indices = @transform_23, window_bounds = array<i64: 16, 32>}]} {
    %c0_i32 = arith.constant 0 : i32
    %0 = arith.cmpi eq, %arg0, %c0_i32 : i32
    %1 = arith.extui %0 : i1 to i32
    %c0_i32_0 = arith.constant 0 : i32
    %2 = arith.cmpi ne, %1, %c0_i32_0 : i32
    scf.if %2 {
      %c0_129 = arith.constant 0 : index
      %c0_130 = arith.constant 0 : index
      %203 = vector.load %arg1[%c0_129, %c0_130] : memref<2x32xf32, #tpu.memory_space<vmem>>, vector<2x32xf32>
      %c0_131 = arith.constant 0 : index
      %c0_132 = arith.constant 0 : index
      %204 = vector.load %arg23[%c0_131, %c0_132] : memref<2x32xf32, #tpu.memory_space<vmem>>, vector<2x32xf32>
      tpu.vector_store %arg23[%c0_131, %c0_132], %203 {strides = array<i32>} : memref<2x32xf32, #tpu.memory_space<vmem>>, vector<2x32xf32>,
      %c0_133 = arith.constant 0 : index
      %c0_134 = arith.constant 0 : index
      %205 = vector.load %arg2[%c0_133, %c0_134] : memref<16x32xf32, #tpu.memory_space<vmem>>, vector<16x32xf32>
      %c0_135 = arith.constant 0 : index
      %c0_136 = arith.constant 0 : index
      %206 = vector.load %arg24[%c0_135, %c0_136] : memref<16x32xf32, #tpu.memory_space<vmem>>, vector<16x32xf32>
      tpu.vector_store %arg24[%c0_135, %c0_136], %205 {strides = array<i32>} : memref<16x32xf32, #tpu.memory_space<vmem>>, vector<16x32xf32>,
    } else {
    }
    %c0 = arith.constant 0 : index
    %c0_1 = arith.constant 0 : index
    %3 = vector.load %arg23[%c0, %c0_1] : memref<2x32xf32, #tpu.memory_space<vmem>>, vector<2x32xf32>
    %c0_2 = arith.constant 0 : index
    %c0_3 = arith.constant 0 : index
    %4 = vector.load %arg24[%c0_2, %c0_3] : memref<16x32xf32, #tpu.memory_space<vmem>>, vector<16x32xf32>
    %c0_4 = arith.constant 0 : index
    %c0_5 = arith.constant 0 : index
    %5 = vector.load %arg3[%c0_4, %c0_5] : memref<16x2xf32, #tpu.memory_space<vmem>>, vector<16x2xf32>
    %c0_6 = arith.constant 0 : index
    %c0_7 = arith.constant 0 : index
    %6 = vector.load %arg4[%c0_6, %c0_7] : memref<2x16xf32, #tpu.memory_space<vmem>>, vector<2x16xf32>
    %c0_8 = arith.constant 0 : index
    %c0_9 = arith.constant 0 : index
    %c0_10 = arith.constant 0 : index
    %7 = vector.load %arg7[%c0_8, %c0_9, %c0_10] : memref<1x32x32xbf16, #tpu.memory_space<vmem>>, vector<1x32x32xbf16>
    %8 = vector.shape_cast %7 : vector<1x32x32xbf16> to vector<32x32xbf16>
    %c0_11 = arith.constant 0 : index
    %c0_12 = arith.constant 0 : index
    %c0_13 = arith.constant 0 : index
    %9 = vector.load %arg8[%c0_11, %c0_12, %c0_13] : memref<1x1x32xf32, #tpu.memory_space<vmem>>, vector<1x1x32xf32>
    %10 = vector.shape_cast %9 : vector<1x1x32xf32> to vector<1x32xf32>
    %11 = arith.truncf %3 : vector<2x32xf32> to vector<2x32xbf16>
    %cst = arith.constant dense<0.000000e+00> : vector<2x32xf32>
    %12 = tpu.matmul %11, %8, %cst {dimension_numbers = #tpu.dot_dimension_numbers<[1], [0], [0], [1], [0, 0, 1, 1], [], []>} : vector<2x32xbf16>, vector<32x32xbf16>, vector<2x32xf32> -> vector<2x32xf32>
    %13 = vector.broadcast %10 : vector<1x32xf32> to vector<2x32xf32>
    %14 = arith.addf %12, %13 : vector<2x32xf32>
    %c0_14 = arith.constant 0 : index
    %c0_15 = arith.constant 0 : index
    %c0_16 = arith.constant 0 : index
    %15 = vector.load %arg9[%c0_14, %c0_15, %c0_16] : memref<1x32x32xbf16, #tpu.memory_space<vmem>>, vector<1x32x32xbf16>
    %16 = vector.shape_cast %15 : vector<1x32x32xbf16> to vector<32x32xbf16>
    %c0_17 = arith.constant 0 : index
    %c0_18 = arith.constant 0 : index
    %c0_19 = arith.constant 0 : index
    %17 = vector.load %arg10[%c0_17, %c0_18, %c0_19] : memref<1x1x32xf32, #tpu.memory_space<vmem>>, vector<1x1x32xf32>
    %18 = vector.shape_cast %17 : vector<1x1x32xf32> to vector<1x32xf32>
    %19 = arith.truncf %4 : vector<16x32xf32> to vector<16x32xbf16>
    %cst_20 = arith.constant dense<0.000000e+00> : vector<16x32xf32>
    %20 = tpu.matmul %19, %16, %cst_20 {dimension_numbers = #tpu.dot_dimension_numbers<[1], [0], [0], [1], [0, 0, 1, 1], [], []>} : vector<16x32xbf16>, vector<32x32xbf16>, vector<16x32xf32> -> vector<16x32xf32>
    %21 = vector.broadcast %18 : vector<1x32xf32> to vector<16x32xf32>
    %22 = arith.addf %20, %21 : vector<16x32xf32>
    %c0_21 = arith.constant 0 : index
    %c0_22 = arith.constant 0 : index
    %c0_23 = arith.constant 0 : index
    %23 = vector.load %arg11[%c0_21, %c0_22, %c0_23] : memref<1x32x32xbf16, #tpu.memory_space<vmem>>, vector<1x32x32xbf16>
    %24 = vector.shape_cast %23 : vector<1x32x32xbf16> to vector<32x32xbf16>
    %c0_24 = arith.constant 0 : index
    %c0_25 = arith.constant 0 : index
    %c0_26 = arith.constant 0 : index
    %25 = vector.load %arg12[%c0_24, %c0_25, %c0_26] : memref<1x1x32xf32, #tpu.memory_space<vmem>>, vector<1x1x32xf32>
    %26 = vector.shape_cast %25 : vector<1x1x32xf32> to vector<1x32xf32>
    %27 = arith.truncf %4 : vector<16x32xf32> to vector<16x32xbf16>
    %cst_27 = arith.constant dense<0.000000e+00> : vector<16x32xf32>
    %28 = tpu.matmul %27, %24, %cst_27 {dimension_numbers = #tpu.dot_dimension_numbers<[1], [0], [0], [1], [0, 0, 1, 1], [], []>} : vector<16x32xbf16>, vector<32x32xbf16>, vector<16x32xf32> -> vector<16x32xf32>
    %29 = vector.broadcast %26 : vector<1x32xf32> to vector<16x32xf32>
    %30 = arith.addf %28, %29 : vector<16x32xf32>
    %cst_28 = arith.constant dense<0.000000e+00> : vector<16x32xf32>
    %31 = tpu.matmul %5, %14, %cst_28 {dimension_numbers = #tpu.dot_dimension_numbers<[1], [0], [0], [1], [0, 0, 1, 1], [], []>} : vector<16x2xf32>, vector<2x32xf32>, vector<16x32xf32> -> vector<16x32xf32>
    %32 = arith.mulf %31, %22 : vector<16x32xf32>
    %c0_29 = arith.constant 0 : index
    %c0_30 = arith.constant 0 : index
    %33 = vector.load %arg5[%c0_29, %c0_30] : memref<32x4xf32, #tpu.memory_space<vmem>>, vector<32x4xf32>
    %cst_31 = arith.constant dense<0.000000e+00> : vector<16x4xf32>
    %34 = tpu.matmul %32, %33, %cst_31 {dimension_numbers = #tpu.dot_dimension_numbers<[1], [0], [0], [1], [0, 0, 1, 1], [], []>} : vector<16x32xf32>, vector<32x4xf32>, vector<16x4xf32> -> vector<16x4xf32>
    %cst_32 = arith.constant dense<0xFF800000> : vector<4xf32>
    %35 = vector.multi_reduction <maximumf>, %34, %cst_32 [0] : vector<16x4xf32> to vector<4xf32>
    %36 = vector.shape_cast %35 : vector<4xf32> to vector<1x4xf32>
    %37 = vector.broadcast %36 : vector<1x4xf32> to vector<16x4xf32>
    %38 = arith.subf %34, %37 : vector<16x4xf32>
    %39 = math.exp %38 : vector<16x4xf32>
    %cst_33 = arith.constant dense<0.000000e+00> : vector<2x4xf32>
    %40 = tpu.matmul %6, %39, %cst_33 {dimension_numbers = #tpu.dot_dimension_numbers<[1], [0], [0], [1], [0, 0, 1, 1], [], []>} : vector<2x16xf32>, vector<16x4xf32>, vector<2x4xf32> -> vector<2x4xf32>
    %41 = tpu.reciprocal %40 {approx = true} : vector<2x4xf32> -> vector<2x4xf32>
    %cst_34 = arith.constant dense<0.000000e+00> : vector<16x4xf32>
    %42 = tpu.matmul %5, %41, %cst_34 {dimension_numbers = #tpu.dot_dimension_numbers<[1], [0], [0], [1], [0, 0, 1, 1], [], []>} : vector<16x2xf32>, vector<2x4xf32>, vector<16x4xf32> -> vector<16x4xf32>
    %43 = arith.mulf %39, %42 : vector<16x4xf32>
    %c0_35 = arith.constant 0 : index
    %c0_36 = arith.constant 0 : index
    %44 = vector.load %arg6[%c0_35, %c0_36] : memref<4x32xf32, #tpu.memory_space<vmem>>, vector<4x32xf32>
    %cst_37 = arith.constant dense<0.000000e+00> : vector<16x32xf32>
    %45 = tpu.matmul %43, %44, %cst_37 {dimension_numbers = #tpu.dot_dimension_numbers<[1], [0], [0], [1], [0, 0, 1, 1], [], []>} : vector<16x4xf32>, vector<4x32xf32>, vector<16x32xf32> -> vector<16x32xf32>
    %46 = arith.mulf %45, %30 : vector<16x32xf32>
    %cst_38 = arith.constant dense<0.000000e+00> : vector<2x32xf32>
    %47 = tpu.matmul %6, %46, %cst_38 {dimension_numbers = #tpu.dot_dimension_numbers<[1], [0], [0], [1], [0, 0, 1, 1], [], []>} : vector<2x16xf32>, vector<16x32xf32>, vector<2x32xf32> -> vector<2x32xf32>
    %c0_39 = arith.constant 0 : index
    %c0_40 = arith.constant 0 : index
    %c0_41 = arith.constant 0 : index
    %48 = vector.load %arg13[%c0_39, %c0_40, %c0_41] : memref<1x32x32xbf16, #tpu.memory_space<vmem>>, vector<1x32x32xbf16>
    %49 = vector.shape_cast %48 : vector<1x32x32xbf16> to vector<32x32xbf16>
    %c0_42 = arith.constant 0 : index
    %c0_43 = arith.constant 0 : index
    %c0_44 = arith.constant 0 : index
    %50 = vector.load %arg14[%c0_42, %c0_43, %c0_44] : memref<1x1x32xf32, #tpu.memory_space<vmem>>, vector<1x1x32xf32>
    %51 = vector.shape_cast %50 : vector<1x1x32xf32> to vector<1x32xf32>
    %52 = arith.truncf %47 : vector<2x32xf32> to vector<2x32xbf16>
    %cst_45 = arith.constant dense<0.000000e+00> : vector<2x32xf32>
    %53 = tpu.matmul %52, %49, %cst_45 {dimension_numbers = #tpu.dot_dimension_numbers<[1], [0], [0], [1], [0, 0, 1, 1], [], []>} : vector<2x32xbf16>, vector<32x32xbf16>, vector<2x32xf32> -> vector<2x32xf32>
    %54 = vector.broadcast %51 : vector<1x32xf32> to vector<2x32xf32>
    %55 = arith.addf %53, %54 : vector<2x32xf32>
    %56 = arith.addf %3, %55 : vector<2x32xf32>
    %c0_46 = arith.constant 0 : index
    %c0_47 = arith.constant 0 : index
    %c0_48 = arith.constant 0 : index
    %c0_49 = arith.constant 0 : index
    %57 = vector.load %arg17[%c0_46, %c0_47, %c0_48, %c0_49] : memref<1x2x1x32xf32, #tpu.memory_space<vmem>>, vector<1x1x1x32xf32>
    %58 = vector.shape_cast %57 : vector<1x1x1x32xf32> to vector<1x32xf32>
    %c0_50 = arith.constant 0 : index
    %c0_51 = arith.constant 0 : index
    %c0_52 = arith.constant 0 : index
    %c0_53 = arith.constant 0 : index
    %59 = vector.load %arg18[%c0_50, %c0_51, %c0_52, %c0_53] : memref<1x2x1x32xf32, #tpu.memory_space<vmem>>, vector<1x1x1x32xf32>
    %60 = vector.shape_cast %59 : vector<1x1x1x32xf32> to vector<1x32xf32>
    %cst_54 = arith.constant dense<0.000000e+00> : vector<2xf32>
    %61 = vector.multi_reduction <add>, %56, %cst_54 [1] : vector<2x32xf32> to vector<2xf32>
    %62 = vector.shape_cast %61 : vector<2xf32> to vector<2x1xf32>
    %cst_55 = arith.constant 3.200000e+01 : f32
    %63 = vector.broadcast %cst_55 : f32 to vector<2x1xf32>
    %64 = arith.divf %62, %63 : vector<2x1xf32>
    %65 = vector.broadcast %64 : vector<2x1xf32> to vector<2x32xf32>
    %66 = arith.subf %56, %65 : vector<2x32xf32>
    %67 = arith.mulf %66, %66 : vector<2x32xf32>
    %cst_56 = arith.constant dense<0.000000e+00> : vector<2xf32>
    %68 = vector.multi_reduction <add>, %67, %cst_56 [1] : vector<2x32xf32> to vector<2xf32>
    %69 = vector.shape_cast %68 : vector<2xf32> to vector<2x1xf32>
    %cst_57 = arith.constant 3.200000e+01 : f32
    %70 = vector.broadcast %cst_57 : f32 to vector<2x1xf32>
    %71 = arith.divf %69, %70 : vector<2x1xf32>
    %72 = vector.broadcast %64 : vector<2x1xf32> to vector<2x32xf32>
    %73 = arith.subf %56, %72 : vector<2x32xf32>
    %cst_58 = arith.constant 9.99999974E-6 : f32
    %74 = vector.broadcast %cst_58 : f32 to vector<2x1xf32>
    %75 = arith.addf %71, %74 : vector<2x1xf32>
    %76 = math.rsqrt %75 : vector<2x1xf32>
    %77 = vector.broadcast %76 : vector<2x1xf32> to vector<2x32xf32>
    %78 = arith.mulf %73, %77 : vector<2x32xf32>
    %79 = vector.broadcast %58 : vector<1x32xf32> to vector<2x32xf32>
    %80 = arith.mulf %78, %79 : vector<2x32xf32>
    %81 = vector.broadcast %60 : vector<1x32xf32> to vector<2x32xf32>
    %82 = arith.addf %80, %81 : vector<2x32xf32>
    %c0_59 = arith.constant 0 : index
    %c0_60 = arith.constant 0 : index
    %c0_61 = arith.constant 0 : index
    %c0_62 = arith.constant 0 : index
    %83 = vector.load %arg19[%c0_59, %c0_60, %c0_61, %c0_62] : memref<1x2x32x32xbf16, #tpu.memory_space<vmem>>, vector<1x1x32x32xbf16>
    %84 = vector.shape_cast %83 : vector<1x1x32x32xbf16> to vector<32x32xbf16>
    %c0_63 = arith.constant 0 : index
    %c0_64 = arith.constant 0 : index
    %c0_65 = arith.constant 0 : index
    %c0_66 = arith.constant 0 : index
    %85 = vector.load %arg20[%c0_63, %c0_64, %c0_65, %c0_66] : memref<1x2x1x32xf32, #tpu.memory_space<vmem>>, vector<1x1x1x32xf32>
    %86 = vector.shape_cast %85 : vector<1x1x1x32xf32> to vector<1x32xf32>
    %87 = arith.truncf %82 : vector<2x32xf32> to vector<2x32xbf16>
    %cst_67 = arith.constant dense<0.000000e+00> : vector<2x32xf32>
    %88 = tpu.matmul %87, %84, %cst_67 {dimension_numbers = #tpu.dot_dimension_numbers<[1], [0], [0], [1], [0, 0, 1, 1], [], []>} : vector<2x32xbf16>, vector<32x32xbf16>, vector<2x32xf32> -> vector<2x32xf32>
    %89 = vector.broadcast %86 : vector<1x32xf32> to vector<2x32xf32>
    %90 = arith.addf %88, %89 : vector<2x32xf32>
    %91 = arith.addf %82, %90 : vector<2x32xf32>
    %c0_68 = arith.constant 0 : index
    %c0_69 = arith.constant 0 : index
    %c0_70 = arith.constant 0 : index
    %c0_71 = arith.constant 0 : index
    %92 = vector.load %arg21[%c0_68, %c0_69, %c0_70, %c0_71] : memref<1x2x1x32xf32, #tpu.memory_space<vmem>>, vector<1x1x1x32xf32>
    %93 = vector.shape_cast %92 : vector<1x1x1x32xf32> to vector<1x32xf32>
    %c0_72 = arith.constant 0 : index
    %c0_73 = arith.constant 0 : index
    %c0_74 = arith.constant 0 : index
    %c0_75 = arith.constant 0 : index
    %94 = vector.load %arg22[%c0_72, %c0_73, %c0_74, %c0_75] : memref<1x2x1x32xf32, #tpu.memory_space<vmem>>, vector<1x1x1x32xf32>
    %95 = vector.shape_cast %94 : vector<1x1x1x32xf32> to vector<1x32xf32>
    %cst_76 = arith.constant dense<0.000000e+00> : vector<2xf32>
    %96 = vector.multi_reduction <add>, %91, %cst_76 [1] : vector<2x32xf32> to vector<2xf32>
    %97 = vector.shape_cast %96 : vector<2xf32> to vector<2x1xf32>
    %cst_77 = arith.constant 3.200000e+01 : f32
    %98 = vector.broadcast %cst_77 : f32 to vector<2x1xf32>
    %99 = arith.divf %97, %98 : vector<2x1xf32>
    %100 = vector.broadcast %99 : vector<2x1xf32> to vector<2x32xf32>
    %101 = arith.subf %91, %100 : vector<2x32xf32>
    %102 = arith.mulf %101, %101 : vector<2x32xf32>
    %cst_78 = arith.constant dense<0.000000e+00> : vector<2xf32>
    %103 = vector.multi_reduction <add>, %102, %cst_78 [1] : vector<2x32xf32> to vector<2xf32>
    %104 = vector.shape_cast %103 : vector<2xf32> to vector<2x1xf32>
    %cst_79 = arith.constant 3.200000e+01 : f32
    %105 = vector.broadcast %cst_79 : f32 to vector<2x1xf32>
    %106 = arith.divf %104, %105 : vector<2x1xf32>
    %107 = vector.broadcast %99 : vector<2x1xf32> to vector<2x32xf32>
    %108 = arith.subf %91, %107 : vector<2x32xf32>
    %cst_80 = arith.constant 9.99999974E-6 : f32
    %109 = vector.broadcast %cst_80 : f32 to vector<2x1xf32>
    %110 = arith.addf %106, %109 : vector<2x1xf32>
    %111 = math.rsqrt %110 : vector<2x1xf32>
    %112 = vector.broadcast %111 : vector<2x1xf32> to vector<2x32xf32>
    %113 = arith.mulf %108, %112 : vector<2x32xf32>
    %114 = vector.broadcast %93 : vector<1x32xf32> to vector<2x32xf32>
    %115 = arith.mulf %113, %114 : vector<2x32xf32>
    %116 = vector.broadcast %95 : vector<1x32xf32> to vector<2x32xf32>
    %117 = arith.addf %115, %116 : vector<2x32xf32>
    %118 = arith.negf %117 : vector<2x32xf32>
    %119 = math.exp %118 : vector<2x32xf32>
    %cst_81 = arith.constant 1.000000e+00 : f32
    %120 = vector.broadcast %cst_81 : f32 to vector<2x32xf32>
    %121 = arith.addf %120, %119 : vector<2x32xf32>
    %122 = arith.divf %120, %121 : vector<2x32xf32>
    %123 = arith.mulf %117, %122 : vector<2x32xf32>
    %c0_82 = arith.constant 0 : index
    %c0_83 = arith.constant 0 : index
    %c0_84 = arith.constant 0 : index
    %124 = vector.load %arg15[%c0_82, %c0_83, %c0_84] : memref<1x32x32xbf16, #tpu.memory_space<vmem>>, vector<1x32x32xbf16>
    %125 = vector.shape_cast %124 : vector<1x32x32xbf16> to vector<32x32xbf16>
    %c0_85 = arith.constant 0 : index
    %c0_86 = arith.constant 0 : index
    %c0_87 = arith.constant 0 : index
    %126 = vector.load %arg16[%c0_85, %c0_86, %c0_87] : memref<1x1x32xf32, #tpu.memory_space<vmem>>, vector<1x1x32xf32>
    %127 = vector.shape_cast %126 : vector<1x1x32xf32> to vector<1x32xf32>
    %128 = arith.truncf %3 : vector<2x32xf32> to vector<2x32xbf16>
    %cst_88 = arith.constant dense<0.000000e+00> : vector<2x32xf32>
    %129 = tpu.matmul %128, %125, %cst_88 {dimension_numbers = #tpu.dot_dimension_numbers<[1], [0], [0], [1], [0, 0, 1, 1], [], []>} : vector<2x32xbf16>, vector<32x32xbf16>, vector<2x32xf32> -> vector<2x32xf32>
    %130 = vector.broadcast %127 : vector<1x32xf32> to vector<2x32xf32>
    %131 = arith.addf %129, %130 : vector<2x32xf32>
    %cst_89 = arith.constant dense<0.000000e+00> : vector<16x32xf32>
    %132 = tpu.matmul %5, %131, %cst_89 {dimension_numbers = #tpu.dot_dimension_numbers<[1], [0], [0], [1], [0, 0, 1, 1], [], []>} : vector<16x2xf32>, vector<2x32xf32>, vector<16x32xf32> -> vector<16x32xf32>
    %133 = arith.addf %4, %132 : vector<16x32xf32>
    %c0_90 = arith.constant 0 : index
    %c1 = arith.constant 1 : index
    %c0_91 = arith.constant 0 : index
    %c0_92 = arith.constant 0 : index
    %134 = vector.load %arg17[%c0_90, %c1, %c0_91, %c0_92] : memref<1x2x1x32xf32, #tpu.memory_space<vmem>>, vector<1x1x1x32xf32>
    %135 = vector.shape_cast %134 : vector<1x1x1x32xf32> to vector<1x32xf32>
    %c0_93 = arith.constant 0 : index
    %c1_94 = arith.constant 1 : index
    %c0_95 = arith.constant 0 : index
    %c0_96 = arith.constant 0 : index
    %136 = vector.load %arg18[%c0_93, %c1_94, %c0_95, %c0_96] : memref<1x2x1x32xf32, #tpu.memory_space<vmem>>, vector<1x1x1x32xf32>
    %137 = vector.shape_cast %136 : vector<1x1x1x32xf32> to vector<1x32xf32>
    %cst_97 = arith.constant dense<0.000000e+00> : vector<16xf32>
    %138 = vector.multi_reduction <add>, %133, %cst_97 [1] : vector<16x32xf32> to vector<16xf32>
    %139 = vector.shape_cast %138 : vector<16xf32> to vector<16x1xf32>
    %cst_98 = arith.constant 3.200000e+01 : f32
    %140 = vector.broadcast %cst_98 : f32 to vector<16x1xf32>
    %141 = arith.divf %139, %140 : vector<16x1xf32>
    %142 = vector.broadcast %141 : vector<16x1xf32> to vector<16x32xf32>
    %143 = arith.subf %133, %142 : vector<16x32xf32>
    %144 = arith.mulf %143, %143 : vector<16x32xf32>
    %cst_99 = arith.constant dense<0.000000e+00> : vector<16xf32>
    %145 = vector.multi_reduction <add>, %144, %cst_99 [1] : vector<16x32xf32> to vector<16xf32>
    %146 = vector.shape_cast %145 : vector<16xf32> to vector<16x1xf32>
    %cst_100 = arith.constant 3.200000e+01 : f32
    %147 = vector.broadcast %cst_100 : f32 to vector<16x1xf32>
    %148 = arith.divf %146, %147 : vector<16x1xf32>
    %149 = vector.broadcast %141 : vector<16x1xf32> to vector<16x32xf32>
    %150 = arith.subf %133, %149 : vector<16x32xf32>
    %cst_101 = arith.constant 9.99999974E-6 : f32
    %151 = vector.broadcast %cst_101 : f32 to vector<16x1xf32>
    %152 = arith.addf %148, %151 : vector<16x1xf32>
    %153 = math.rsqrt %152 : vector<16x1xf32>
    %154 = vector.broadcast %153 : vector<16x1xf32> to vector<16x32xf32>
    %155 = arith.mulf %150, %154 : vector<16x32xf32>
    %156 = vector.broadcast %135 : vector<1x32xf32> to vector<16x32xf32>
    %157 = arith.mulf %155, %156 : vector<16x32xf32>
    %158 = vector.broadcast %137 : vector<1x32xf32> to vector<16x32xf32>
    %159 = arith.addf %157, %158 : vector<16x32xf32>
    %c0_102 = arith.constant 0 : index
    %c1_103 = arith.constant 1 : index
    %c0_104 = arith.constant 0 : index
    %c0_105 = arith.constant 0 : index
    %160 = vector.load %arg19[%c0_102, %c1_103, %c0_104, %c0_105] : memref<1x2x32x32xbf16, #tpu.memory_space<vmem>>, vector<1x1x32x32xbf16>
    %161 = vector.shape_cast %160 : vector<1x1x32x32xbf16> to vector<32x32xbf16>
    %c0_106 = arith.constant 0 : index
    %c1_107 = arith.constant 1 : index
    %c0_108 = arith.constant 0 : index
    %c0_109 = arith.constant 0 : index
    %162 = vector.load %arg20[%c0_106, %c1_107, %c0_108, %c0_109] : memref<1x2x1x32xf32, #tpu.memory_space<vmem>>, vector<1x1x1x32xf32>
    %163 = vector.shape_cast %162 : vector<1x1x1x32xf32> to vector<1x32xf32>
    %164 = arith.truncf %159 : vector<16x32xf32> to vector<16x32xbf16>
    %cst_110 = arith.constant dense<0.000000e+00> : vector<16x32xf32>
    %165 = tpu.matmul %164, %161, %cst_110 {dimension_numbers = #tpu.dot_dimension_numbers<[1], [0], [0], [1], [0, 0, 1, 1], [], []>} : vector<16x32xbf16>, vector<32x32xbf16>, vector<16x32xf32> -> vector<16x32xf32>
    %166 = vector.broadcast %163 : vector<1x32xf32> to vector<16x32xf32>
    %167 = arith.addf %165, %166 : vector<16x32xf32>
    %168 = arith.addf %159, %167 : vector<16x32xf32>
    %c0_111 = arith.constant 0 : index
    %c1_112 = arith.constant 1 : index
    %c0_113 = arith.constant 0 : index
    %c0_114 = arith.constant 0 : index
    %169 = vector.load %arg21[%c0_111, %c1_112, %c0_113, %c0_114] : memref<1x2x1x32xf32, #tpu.memory_space<vmem>>, vector<1x1x1x32xf32>
    %170 = vector.shape_cast %169 : vector<1x1x1x32xf32> to vector<1x32xf32>
    %c0_115 = arith.constant 0 : index
    %c1_116 = arith.constant 1 : index
    %c0_117 = arith.constant 0 : index
    %c0_118 = arith.constant 0 : index
    %171 = vector.load %arg22[%c0_115, %c1_116, %c0_117, %c0_118] : memref<1x2x1x32xf32, #tpu.memory_space<vmem>>, vector<1x1x1x32xf32>
    %172 = vector.shape_cast %171 : vector<1x1x1x32xf32> to vector<1x32xf32>
    %cst_119 = arith.constant dense<0.000000e+00> : vector<16xf32>
    %173 = vector.multi_reduction <add>, %168, %cst_119 [1] : vector<16x32xf32> to vector<16xf32>
    %174 = vector.shape_cast %173 : vector<16xf32> to vector<16x1xf32>
    %cst_120 = arith.constant 3.200000e+01 : f32
    %175 = vector.broadcast %cst_120 : f32 to vector<16x1xf32>
    %176 = arith.divf %174, %175 : vector<16x1xf32>
    %177 = vector.broadcast %176 : vector<16x1xf32> to vector<16x32xf32>
    %178 = arith.subf %168, %177 : vector<16x32xf32>
    %179 = arith.mulf %178, %178 : vector<16x32xf32>
    %cst_121 = arith.constant dense<0.000000e+00> : vector<16xf32>
    %180 = vector.multi_reduction <add>, %179, %cst_121 [1] : vector<16x32xf32> to vector<16xf32>
    %181 = vector.shape_cast %180 : vector<16xf32> to vector<16x1xf32>
    %cst_122 = arith.constant 3.200000e+01 : f32
    %182 = vector.broadcast %cst_122 : f32 to vector<16x1xf32>
    %183 = arith.divf %181, %182 : vector<16x1xf32>
    %184 = vector.broadcast %176 : vector<16x1xf32> to vector<16x32xf32>
    %185 = arith.subf %168, %184 : vector<16x32xf32>
    %cst_123 = arith.constant 9.99999974E-6 : f32
    %186 = vector.broadcast %cst_123 : f32 to vector<16x1xf32>
    %187 = arith.addf %183, %186 : vector<16x1xf32>
    %188 = math.rsqrt %187 : vector<16x1xf32>
    %189 = vector.broadcast %188 : vector<16x1xf32> to vector<16x32xf32>
    %190 = arith.mulf %185, %189 : vector<16x32xf32>
    %191 = vector.broadcast %170 : vector<1x32xf32> to vector<16x32xf32>
    %192 = arith.mulf %190, %191 : vector<16x32xf32>
    %193 = vector.broadcast %172 : vector<1x32xf32> to vector<16x32xf32>
    %194 = arith.addf %192, %193 : vector<16x32xf32>
    %195 = arith.negf %194 : vector<16x32xf32>
    %196 = math.exp %195 : vector<16x32xf32>
    %cst_124 = arith.constant 1.000000e+00 : f32
    %197 = vector.broadcast %cst_124 : f32 to vector<16x32xf32>
    %198 = arith.addf %197, %196 : vector<16x32xf32>
    %199 = arith.divf %197, %198 : vector<16x32xf32>
    %200 = arith.mulf %194, %199 : vector<16x32xf32>
    %c0_125 = arith.constant 0 : index
    %c0_126 = arith.constant 0 : index
    %201 = vector.load %arg23[%c0_125, %c0_126] : memref<2x32xf32, #tpu.memory_space<vmem>>, vector<2x32xf32>
    tpu.vector_store %arg23[%c0_125, %c0_126], %123 {strides = array<i32>} : memref<2x32xf32, #tpu.memory_space<vmem>>, vector<2x32xf32>,
    %c0_127 = arith.constant 0 : index
    %c0_128 = arith.constant 0 : index
    %202 = vector.load %arg24[%c0_127, %c0_128] : memref<16x32xf32, #tpu.memory_space<vmem>>, vector<16x32xf32>
    tpu.vector_store %arg24[%c0_127, %c0_128], %200 {strides = array<i32>} : memref<16x32xf32, #tpu.memory_space<vmem>>, vector<16x32xf32>,
    return
  }
  func.func @transform_0(%arg0: i32) -> (i32, i32) {
    %c0_i32 = arith.constant 0 : i32
    %c0_i32_0 = arith.constant 0 : i32
    %c0_i32_1 = arith.constant 0 : i32
    return %c0_i32, %c0_i32_0 : i32, i32
  }
  func.func @transform_1(%arg0: i32) -> (i32, i32) {
    %c0_i32 = arith.constant 0 : i32
    %c0_i32_0 = arith.constant 0 : i32
    %c0_i32_1 = arith.constant 0 : i32
    return %c0_i32, %c0_i32_0 : i32, i32
  }
  func.func @transform_2(%arg0: i32) -> (i32, i32) {
    %c0_i32 = arith.constant 0 : i32
    %c0_i32_0 = arith.constant 0 : i32
    %c0_i32_1 = arith.constant 0 : i32
    return %c0_i32, %c0_i32_0 : i32, i32
  }
  func.func @transform_3(%arg0: i32) -> (i32, i32) {
    %c0_i32 = arith.constant 0 : i32
    %c0_i32_0 = arith.constant 0 : i32
    %c0_i32_1 = arith.constant 0 : i32
    return %c0_i32, %c0_i32_0 : i32, i32
  }
  func.func @transform_4(%arg0: i32) -> (i32, i32) {
    %c0_i32 = arith.constant 0 : i32
    %c0_i32_0 = arith.constant 0 : i32
    %c0_i32_1 = arith.constant 0 : i32
    return %c0_i32, %c0_i32_0 : i32, i32
  }
  func.func @transform_5(%arg0: i32) -> (i32, i32) {
    %c0_i32 = arith.constant 0 : i32
    %c0_i32_0 = arith.constant 0 : i32
    %c0_i32_1 = arith.constant 0 : i32
    return %c0_i32, %c0_i32_0 : i32, i32
  }
  func.func @transform_6(%arg0: i32) -> (i32, i32, i32) {
    %c0_i32 = arith.constant 0 : i32
    %c0_i32_0 = arith.constant 0 : i32
    %c0_i32_1 = arith.constant 0 : i32
    return %arg0, %c0_i32, %c0_i32_0 : i32, i32, i32
  }
  func.func @transform_7(%arg0: i32) -> (i32, i32, i32) {
    %c0_i32 = arith.constant 0 : i32
    %c0_i32_0 = arith.constant 0 : i32
    %c0_i32_1 = arith.constant 0 : i32
    return %arg0, %c0_i32, %c0_i32_0 : i32, i32, i32
  }
  func.func @transform_8(%arg0: i32) -> (i32, i32, i32) {
    %c0_i32 = arith.constant 0 : i32
    %c0_i32_0 = arith.constant 0 : i32
    %c0_i32_1 = arith.constant 0 : i32
    return %arg0, %c0_i32, %c0_i32_0 : i32, i32, i32
  }
  func.func @transform_9(%arg0: i32) -> (i32, i32, i32) {
    %c0_i32 = arith.constant 0 : i32
    %c0_i32_0 = arith.constant 0 : i32
    %c0_i32_1 = arith.constant 0 : i32
    return %arg0, %c0_i32, %c0_i32_0 : i32, i32, i32
  }
  func.func @transform_10(%arg0: i32) -> (i32, i32, i32) {
    %c0_i32 = arith.constant 0 : i32
    %c0_i32_0 = arith.constant 0 : i32
    %c0_i32_1 = arith.constant 0 : i32
    return %arg0, %c0_i32, %c0_i32_0 : i32, i32, i32
  }
  func.func @transform_11(%arg0: i32) -> (i32, i32, i32) {
    %c0_i32 = arith.constant 0 : i32
    %c0_i32_0 = arith.constant 0 : i32
    %c0_i32_1 = arith.constant 0 : i32
    return %arg0, %c0_i32, %c0_i32_0 : i32, i32, i32
  }
  func.func @transform_12(%arg0: i32) -> (i32, i32, i32) {
    %c0_i32 = arith.constant 0 : i32
    %c0_i32_0 = arith.constant 0 : i32
    %c0_i32_1 = arith.constant 0 : i32
    return %arg0, %c0_i32, %c0_i32_0 : i32, i32, i32
  }
  func.func @transform_13(%arg0: i32) -> (i32, i32, i32) {
    %c0_i32 = arith.constant 0 : i32
    %c0_i32_0 = arith.constant 0 : i32
    %c0_i32_1 = arith.constant 0 : i32
    return %arg0, %c0_i32, %c0_i32_0 : i32, i32, i32
  }
  func.func @transform_14(%arg0: i32) -> (i32, i32, i32) {
    %c0_i32 = arith.constant 0 : i32
    %c0_i32_0 = arith.constant 0 : i32
    %c0_i32_1 = arith.constant 0 : i32
    return %arg0, %c0_i32, %c0_i32_0 : i32, i32, i32
  }
  func.func @transform_15(%arg0: i32) -> (i32, i32, i32) {
    %c0_i32 = arith.constant 0 : i32
    %c0_i32_0 = arith.constant 0 : i32
    %c0_i32_1 = arith.constant 0 : i32
    return %arg0, %c0_i32, %c0_i32_0 : i32, i32, i32
  }
  func.func @transform_16(%arg0: i32) -> (i32, i32, i32, i32) {
    %c0_i32 = arith.constant 0 : i32
    %c0_i32_0 = arith.constant 0 : i32
    %c0_i32_1 = arith.constant 0 : i32
    %c0_i32_2 = arith.constant 0 : i32
    return %arg0, %c0_i32, %c0_i32_0, %c0_i32_1 : i32, i32, i32, i32
  }
  func.func @transform_17(%arg0: i32) -> (i32, i32, i32, i32) {
    %c0_i32 = arith.constant 0 : i32
    %c0_i32_0 = arith.constant 0 : i32
    %c0_i32_1 = arith.constant 0 : i32
    %c0_i32_2 = arith.constant 0 : i32
    return %arg0, %c0_i32, %c0_i32_0, %c0_i32_1 : i32, i32, i32, i32
  }
  func.func @transform_18(%arg0: i32) -> (i32, i32, i32, i32) {
    %c0_i32 = arith.constant 0 : i32
    %c0_i32_0 = arith.constant 0 : i32
    %c0_i32_1 = arith.constant 0 : i32
    %c0_i32_2 = arith.constant 0 : i32
    return %arg0, %c0_i32, %c0_i32_0, %c0_i32_1 : i32, i32, i32, i32
  }
  func.func @transform_19(%arg0: i32) -> (i32, i32, i32, i32) {
    %c0_i32 = arith.constant 0 : i32
    %c0_i32_0 = arith.constant 0 : i32
    %c0_i32_1 = arith.constant 0 : i32
    %c0_i32_2 = arith.constant 0 : i32
    return %arg0, %c0_i32, %c0_i32_0, %c0_i32_1 : i32, i32, i32, i32
  }
  func.func @transform_20(%arg0: i32) -> (i32, i32, i32, i32) {
    %c0_i32 = arith.constant 0 : i32
    %c0_i32_0 = arith.constant 0 : i32
    %c0_i32_1 = arith.constant 0 : i32
    %c0_i32_2 = arith.constant 0 : i32
    return %arg0, %c0_i32, %c0_i32_0, %c0_i32_1 : i32, i32, i32, i32
  }
  func.func @transform_21(%arg0: i32) -> (i32, i32, i32, i32) {
    %c0_i32 = arith.constant 0 : i32
    %c0_i32_0 = arith.constant 0 : i32
    %c0_i32_1 = arith.constant 0 : i32
    %c0_i32_2 = arith.constant 0 : i32
    return %arg0, %c0_i32, %c0_i32_0, %c0_i32_1 : i32, i32, i32, i32
  }
  func.func @transform_22(%arg0: i32) -> (i32, i32) {
    %c0_i32 = arith.constant 0 : i32
    %c0_i32_0 = arith.constant 0 : i32
    %c0_i32_1 = arith.constant 0 : i32
    return %c0_i32, %c0_i32_0 : i32, i32
  }
  func.func @transform_23(%arg0: i32) -> (i32, i32) {
    %c0_i32 = arith.constant 0 : i32
    %c0_i32_0 = arith.constant 0 : i32
    %c0_i32_1 = arith.constant 0 : i32
    return %c0_i32, %c0_i32_0 : i32, i32
  }
}

</mosaic_0001>

<bundles_post_ra>
// kernel: dbc_attention_forward.1
= control target key start
LH: loop header
LB: loop body
LE: loop exit
PB: predicated region body
PF: predicated region fallthrough
CT: control target
= control target key end

     0   :  { %s4280_s0 = inlined_call_operand.vmem [shape: f32[2,32], index: 0, kind: input, shape index: {}]   ;;  %s4281_s1 = inlined_call_operand.vmem [shape: f32[16,32], index: 1, kind: input, shape index: {}]   ;;  %s4282_s2 = inlined_call_operand.vmem [shape: f32[16,2], index: 2, kind: input, shape index: {}]   ;;  %s4283_s3 = inlined_call_operand.vmem [shape: f32[2,16], index: 3, kind: input, shape index: {}]   ;;  %s4284_s4 = inlined_call_operand.vmem [shape: f32[32,4], index: 4, kind: input, shape index: {}]   ;;  %s4285_s5 = inlined_call_operand.vmem [shape: f32[4,32], index: 5, kind: input, shape index: {}]   ;;  %s4286_s6 = inlined_call_operand.vmem [shape: bf16[2,32,32], index: 6, kind: input, shape index: {}]   ;;  %s4287_s7 = inlined_call_operand.hbm [shape: f32[2,1,32], index: 7, kind: input, shape index: {}]   ;;  %s4288_s8 = inlined_call_operand.vmem [shape: bf16[2,32,32], index: 8, kind: input, shape index: {}]   ;;  %s4289_s9 = inlined_call_operand.hbm [shape: f32[2,1,32], index: 9, kind: input, shape index: {}]   ;;  %s4290_s10 = inlined_call_operand.hbm [shape: bf16[2,32,32], index: 10, kind: input, shape index: {}]   ;;  %s4291_s11 = inlined_call_operand.hbm [shape: f32[2,1,32], index: 11, kind: input, shape index: {}]   ;;  %s4292_s12 = inlined_call_operand.hbm [shape: bf16[2,32,32], index: 12, kind: input, shape index: {}]   ;;  %s4293_s13 = inlined_call_operand.hbm [shape: f32[2,1,32], index: 13, kind: input, shape index: {}]   ;;  %s4294_s14 = inlined_call_operand.hbm [shape: bf16[2,32,32], index: 14, kind: input, shape index: {}]   ;;  %s4295_s15 = inlined_call_operand.hbm [shape: f32[2,1,32], index: 15, kind: input, shape index: {}]   ;;  %s4296_s16 = inlined_call_operand.vmem [shape: f32[2,2,1,32], index: 16, kind: input, shape index: {}]   ;;  %s4297_s17 = inlined_call_operand.vmem [shape: f32[2,2,1,32], index: 17, kind: input, shape index: {}]   ;;  %s4298_s18 = inlined_call_operand.vmem [shape: bf16[2,2,32,32], index: 18, kind: input, shape index: {}]   ;;  %s4299_s19 = inlined_call_operand.vmem [shape: f32[2,2,1,32], index: 19, kind: input, shape index: {}]   ;;  %s4300_s20 = inlined_call_operand.hbm [shape: f32[2,2,1,32], index: 20, kind: input, shape index: {}]   ;;  %s4301_s21 = inlined_call_operand.hbm [shape: f32[2,2,1,32], index: 21, kind: input, shape index: {}]   ;;  %s4302_s22 = inlined_call_operand.vmem [shape: f32[2,32], index: 22, kind: output, shape index: {0}]   ;;  %s4303_s23 = inlined_call_operand.vmem [shape: f32[16,32], index: 23, kind: output, shape index: {1}]  }
   0x1   :  { %4318 = sst [smem:[#allocation27_spill]] %s4280_s0 }
   0x2   :  { %4319 = sst [smem:[#allocation28_spill]] %s4281_s1 }
   0x3   :  { %4320 = sst [smem:[#allocation29_spill]] %s4282_s2 }
   0x4   :  { %4321 = sst [smem:[#allocation30_spill]] %s4283_s3 }
   0x5   :  { %4322 = sst [smem:[#allocation31_spill]] %s4284_s4 }
   0x6   :  { %4323 = sst [smem:[#allocation32_spill]] %s4285_s5 }
   0x7   :  { %4324 = sst [smem:[#allocation33_spill]] %s4286_s6 }
   0x8   :  { %4325 = sst [smem:[#allocation34_spill]] %s4287_s7 }
   0x9   :  { %4326 = sst [smem:[#allocation35_spill]] %s4288_s8 }
   0xa   :  { %4327 = sst [smem:[#allocation36_spill]] %s4289_s9 }
   0xb   :  { %4328 = sst [smem:[#allocation37_spill]] %s4290_s10 }
   0xc   :  { %4329 = sst [smem:[#allocation38_spill]] %s4291_s11 }
   0xd   :  { %4330 = sst [smem:[#allocation39_spill]] %s4292_s12 }
   0xe   :  { %4331 = sst [smem:[#allocation40_spill]] %s4293_s13 }
   0xf   :  { %4332 = sst [smem:[#allocation41_spill]] %s4295_s15 }
  0x10   :  { %4333 = sst [smem:[#allocation42_spill]] %s4297_s17 }
  0x11   :  { %4334 = sst [smem:[#allocation43_spill]] %s4298_s18 }
  0x12   :  { %4335 = sst [smem:[#allocation44_spill]] %s4299_s19 }
  0x13   :  { %4336 = sst [smem:[#allocation45_spill]] %s4302_s22 }
  0x14   :  { %4337 = sst [smem:[#allocation46_spill]] %s4303_s23 }
  0x15   :  { %29 = vsyncpa [#allocation3], 0 }
  0x16   :  { %31 = vsyncpa [#allocation3 + $0x1], 0 }
  0x17   :  { %32 = vsyncpa [#allocation5], 0 }
  0x18   :  { %34 = vsyncpa [#allocation5 + $0x1], 0 }
  0x19   :  { %35 = vsyncpa [#allocation8], 0 }
  0x1a   :  { %37 = vsyncpa [#allocation8 + $0x1], 0 }
  0x1b   :  { %38 = vsyncpa [#allocation11], 0 }
  0x1c   :  { %40 = vsyncpa [#allocation11 + $0x1], 0 }
  0x1d   :  { %41 = vsyncpa [#allocation14], 0 }
  0x1e   :  { %43 = vsyncpa [#allocation14 + $0x1], 0 }
  0x1f   :  { %44 = vsyncpa [#allocation17], 0 }
  0x20   :  { %46 = vsyncpa [#allocation17 + $0x1], 0  ;;  %s3589_s4 = smov 0   ;;  %s3591_s30 = smov 0  }
  0x21   :  { %s3593_s24 = smov 0   ;;  %s3595_s25 = smov 0  }
  0x22 LB: > { %4338 = sst [smem:[#allocation24_spill]] %s3446_s24  ;;  %s3608_s5 = sadd.s32 4294967295, %s3450_s25   ;;  %s3450_s25 = sphi %s3595_s25, %s4394_s25   ;;  %s3446_s24 = sphi %s3593_s24, %s4396_s24   ;;  %s3442_s30 = sphi %s3591_s30, %s4398_s30   ;;  %s3438_s4 = sphi %s3589_s4, %s4397_s4  }
  0x23   : > { %s3611_s1 = sadd.s32 1, %s3450_s25   ;;  %s211_s2 = sadd.s32 1, %s3446_s24 }
  0x24   : > { %4339 = sst [smem:[#allocation25_spill]] %s3611_s1  ;;  %s208_s26 = ssub.s32 %s3450_s25, %s3611_s1 }
  0x25   : > { %p209_p0 = scmp.eq.s32.totalorder %s208_s26, 0  ;;  %p218_p1 = scmp.ne.s32.totalorder %s3446_s24, %s3442_s30 }
  0x26   : > { %p219_p2 = scmp.eq.s32.totalorder %s3450_s25, 0  ;;  %p224_p3 = scmp.ne.s32.totalorder %s3442_s30, %s3438_s4 }
  0x27   : > { %s3621_s6 = scalar_select %p209_p0, %s3446_s24, %s211_s2  }
  0x28   : > { %p220_p4 = por %p219_p2, %p218_p1  ;;  %p225_p5 = scmp.eq.s32.totalorder %s3608_s5, 0 }
  0x29   : > { %4340 = sst [smem:[#allocation26_spill]] %s3621_s6  ;;  %p3012_p6 = scmp.lt.s32.totalorder %s3450_s25, 2 }
  0x2a   : > { %p3625_p7 = por %p225_p5, %p224_p3  ;;  %s3630_s7 = sand.u32 1, %s3446_s24  }
  0x2b   : > { %s3633_s28 = sshll.u32 %s3450_s25, 4  ;;  %p3635_p8 = pnand %p3012_p6, %p220_p4 }
  0x2c   : > { %s4341_s27 = scalar_select %p3625_p7, 1, 0 }
  0x2d   : > { %s4342_s29 = scalar_select %p3635_p8, 1, 0 }
  0x2e   : > { %s3640_s3 = sand.u32 1, %s3450_s25   ;;  %s4343_s9 = sld [smem:[#allocation36_spill]] }
  0x2f   : > { %s708_s2 = scalar_lea.vmem [#allocation4], %s3630_s7  ;;  %p3657_p11 = pneg %p3635_p8 }
  0x30   : > { %s715_s6 = sshll.u32 %s708_s2, 4  ;;  %s3649_s6 = int_to_ptr.vmem [resolvable:$true] %s715_s6 }
  0x34   : > { %s3646_s26 = scalar_lea.hbm %s4343_s9, %s3633_s28  ;;  %s3101_s22 = scalar_lea.hbm %s4343_s9, 32 }
  0x35   : > { %s3096_s1 = scalar_lea.hbm %s3646_s26, 16  ;;  %p3102_p0 = scmp.lt.u32.totalorder %s3646_s26, %s4343_s9 }
  0x36   : > { %p3097_p10 = scmp.ne.s32.totalorder %s3646_s26, %s3096_s1  ;;  %p3103_p1 = scmp.lt.u32.totalorder %s3101_s22, %s3096_s1 }
  0x37   : > { %p3105_p3 = scmp.lt.u32.totalorder %s3096_s1, %s3646_s26 }
  0x38   : > { %p3099_p12 = pnand %p3657_p11, %p3097_p10  ;;  %p3104_p2 = por %p3103_p1, %p3102_p0 }
  0x3a   : > { %p3100_p13 = pneg %p3099_p12  ;;  %p3106_p4 = por %p3105_p3, %p3104_p2 }
  0x3c   : > { %p3107_p5 = pnand %p3106_p4, %p3100_p13 }
  0x3e   : > { %3110 = shalt.err (!%p3107_p5)
}
  0x3f   : > { %s3111_s24 = scalar_lea.vmem %s3649_s6, 16  ;;  %s3452_s0 = smov [#allocation4]  }
  0x40   : > { %p3112_p6 = scmp.ne.s32.totalorder %s3649_s6, %s3111_s24  ;;  %s3116_s4 = sshll.u32 %s3452_s0, 4  ;;  %s3117_s4 = int_to_ptr.vmem [resolvable:$false] %s3116_s4 }
  0x41   : > { %s3118_s18 = scalar_lea.vmem %s3117_s4, 32  ;;  %p3119_p9 = scmp.lt.s32.totalorder %s3649_s6, %s3117_s4 }
  0x42   : > { %p3114_p10 = pnand %p3112_p6, %p3657_p11  ;;  %p3120_p7 = scmp.lt.s32.totalorder %s3118_s18, %s3111_s24 }
  0x44   : > { %p3115_p12 = pneg %p3114_p10  ;;  %p3121_p0 = por %p3120_p7, %p3119_p9 }
  0x46   : > { %p3122_p1 = pnand %p3121_p0, %p3115_p12 }
  0x48   : > { %3125 = shalt.err (!%p3122_p1)
}
  0x49   : > { %s4345_s22 = scalar_lea.sflag [#allocation5], %s3640_s3  ;;  %p905_p13 = scmp.lt.s32.totalorder %s3450_s25, 3 }
  0x4a   : > { %2987 = dma.hbm_to_vmem [thread:$0]  (!%p3635_p8), %s3646_s26, 16, %s3649_s6, %s4345_s22  }
  0x4b   : > { %s4346_s11 = sld [smem:[#allocation38_spill]]  ;;  %p4347_p7 = scmp.ge.s32.totalorder %s3450_s25, 1 }
  0x4c   : > { %s746_s4 = scalar_lea.vmem [#allocation7], %s3630_s7 }
  0x4d   : > { %p3691_p9 = pnand %p4347_p7, %p905_p13  ;;  %s753_s18 = sshll.u32 %s746_s4, 4  ;;  %s754_s18 = int_to_ptr.vmem [resolvable:$true] %s753_s18 }
  0x4f   : > { %s4348_s0 = scalar_select %p3691_p9, 1, 0 }
  0x51   : > { %s3687_s24 = scalar_lea.hbm %s4346_s11, %s3633_s28  ;;  %s3131_s1 = scalar_lea.hbm %s4346_s11, 32 }
  0x52   : > { %s3126_s6 = scalar_lea.hbm %s3687_s24, 16  ;;  %p3132_p5 = scmp.lt.u32.totalorder %s3687_s24, %s4346_s11 }
  0x53   : > { %p3127_p2 = scmp.ne.s32.totalorder %s3687_s24, %s3126_s6  ;;  %p3133_p6 = scmp.lt.u32.totalorder %s3131_s1, %s3126_s6 }
  0x54   : > { %p3135_p12 = scmp.lt.u32.totalorder %s3126_s6, %s3687_s24 }
  0x55   : > { %p3129_p3 = pnand %p3127_p2, %p3657_p11  ;;  %p3134_p10 = por %p3133_p6, %p3132_p5 }
  0x57   : > { %p3130_p4 = pneg %p3129_p3  ;;  %p3136_p0 = por %p3135_p12, %p3134_p10 }
  0x59   : > { %p3137_p1 = pnand %p3136_p0, %p3130_p4 }
  0x5b   : > { %3140 = shalt.err (!%p3137_p1)
}
  0x5c   : > { %s3141_s4 = scalar_lea.vmem %s754_s18, 16  ;;  %s3453_s9 = smov [#allocation7]  }
  0x5d   : > { %p3142_p13 = scmp.ne.s32.totalorder %s754_s18, %s3141_s4  ;;  %s3146_s17 = sshll.u32 %s3453_s9, 4  ;;  %s3147_s17 = int_to_ptr.vmem [resolvable:$false] %s3146_s17 }
  0x5e   : > { %s3148_s26 = scalar_lea.vmem %s3147_s17, 32  ;;  %p3149_p3 = scmp.lt.s32.totalorder %s754_s18, %s3147_s17 }
  0x5f   : > { %p3144_p7 = pnand %p3142_p13, %p3657_p11  ;;  %p3150_p9 = scmp.lt.s32.totalorder %s3148_s26, %s3141_s4 }
  0x61   : > { %p3145_p2 = pneg %p3144_p7  ;;  %p3151_p8 = por %p3150_p9, %p3149_p3 }
  0x63   : > { %p3152_p5 = pnand %p3151_p8, %p3145_p2 }
  0x65   : > { %3155 = shalt.err (!%p3152_p5)
}
  0x66   : > { %p4349_p6 = scmp.ne.s32.totalorder %s4342_s29, 0  ;;  %s4350_s19 = scalar_lea.sflag [#allocation8], %s3640_s3 }
  0x67   : > { %s4351_s13 = sld [smem:[#allocation40_spill]]  ;;  %s784_s17 = scalar_lea.vmem [#allocation10], %s3630_s7 }
  0x68   : > { %2993 = dma.hbm_to_vmem [thread:$0]  (!%p4349_p6), %s3687_s24, 16, %s754_s18, %s4350_s19  }
  0x69   : > { %s791_s1 = sshll.u32 %s784_s17, 4  ;;  %s792_s1 = int_to_ptr.vmem [resolvable:$true] %s791_s1 }
  0x6d   : > { %s3720_s9 = scalar_lea.hbm %s4351_s13, %s3633_s28  ;;  %s3161_s18 = scalar_lea.hbm %s4351_s13, 32 }
  0x6e   : > { %s3156_s4 = scalar_lea.hbm %s3720_s9, 16  ;;  %p3162_p10 = scmp.lt.u32.totalorder %s3720_s9, %s4351_s13 }
  0x6f   : > { %p3157_p8 = scmp.ne.s32.totalorder %s3720_s9, %s3156_s4  ;;  %p3163_p12 = scmp.lt.u32.totalorder %s3161_s18, %s3156_s4 }
  0x70   : > { %p3165_p1 = scmp.lt.u32.totalorder %s3156_s4, %s3720_s9 }
  0x71   : > { %p3159_p9 = pnand %p3157_p8, %p3657_p11  ;;  %p3164_p0 = por %p3163_p12, %p3162_p10 }
  0x73   : > { %p3160_p4 = pneg %p3159_p9  ;;  %p3166_p13 = por %p3165_p1, %p3164_p0 }
  0x75   : > { %p3167_p7 = pnand %p3166_p13, %p3160_p4 }
  0x77   : > { %3170 = shalt.err (!%p3167_p7)
}
  0x78   : > { %s3171_s22 = scalar_lea.vmem %s792_s1, 16  ;;  %s3454_s17 = smov [#allocation10]  }
  0x79   : > { %p3172_p2 = scmp.ne.s32.totalorder %s792_s1, %s3171_s22  ;;  %s3176_s2 = sshll.u32 %s3454_s17, 4  ;;  %s3177_s2 = int_to_ptr.vmem [resolvable:$false] %s3176_s2 }
  0x7a   : > { %s3178_s26 = scalar_lea.vmem %s3177_s2, 32  ;;  %p3179_p8 = scmp.lt.s32.totalorder %s792_s1, %s3177_s2 }
  0x7b   : > { %p3174_p3 = pnand %p3172_p2, %p3657_p11  ;;  %p3180_p9 = scmp.lt.s32.totalorder %s3178_s26, %s3171_s22 }
  0x7d   : > { %p3175_p5 = pneg %p3174_p3  ;;  %p3181_p6 = por %p3180_p9, %p3179_p8 }
  0x7f   : > { %p3182_p10 = pnand %p3181_p6, %p3175_p5 }
  0x81   : > { %3185 = shalt.err (!%p3182_p10)
}
  0x82   : > { %p4352_p12 = scmp.ne.s32.totalorder %s4342_s29, 0  ;;  %s4353_s4 = scalar_lea.sflag [#allocation11], %s3640_s3 }
  0x83   : > { %s4354_s15 = sld [smem:[#allocation41_spill]]  ;;  %s822_s2 = scalar_lea.vmem [#allocation13], %s3630_s7 }
  0x84   : > { %2999 = dma.hbm_to_vmem [thread:$0]  (!%p4352_p12), %s3720_s9, 16, %s792_s1, %s4353_s4  }
  0x85   : > { %s829_s6 = sshll.u32 %s822_s2, 4  ;;  %s830_s6 = int_to_ptr.vmem [resolvable:$true] %s829_s6 }
  0x89   : > { %s3747_s19 = scalar_lea.hbm %s4354_s15, %s3633_s28  ;;  %s3191_s1 = scalar_lea.hbm %s4354_s15, 32 }
  0x8a   : > { %s3186_s17 = scalar_lea.hbm %s3747_s19, 16  ;;  %p3192_p1 = scmp.lt.u32.totalorder %s3747_s19, %s4354_s15 }
  0x8b   : > { %p3187_p6 = scmp.ne.s32.totalorder %s3747_s19, %s3186_s17  ;;  %p3193_p13 = scmp.lt.u32.totalorder %s3191_s1, %s3186_s17 }
  0x8c   : > { %p3195_p2 = scmp.lt.u32.totalorder %s3186_s17, %s3747_s19 }
  0x8d   : > { %p3189_p4 = pnand %p3187_p6, %p3657_p11  ;;  %p3194_p7 = por %p3193_p13, %p3192_p1 }
  0x8f   : > { %p3190_p0 = pneg %p3189_p4  ;;  %p3196_p3 = por %p3195_p2, %p3194_p7 }
  0x91   : > { %p3197_p5 = pnand %p3196_p3, %p3190_p0 }
  0x93   : > { %3200 = shalt.err (!%p3197_p5)
}
  0x94   : > { %s3201_s18 = scalar_lea.vmem %s830_s6, 16  ;;  %s3455_s2 = smov [#allocation13]  }
  0x95   : > { %p3202_p8 = scmp.ne.s32.totalorder %s830_s6, %s3201_s18  ;;  %s3206_s22 = sshll.u32 %s3455_s2, 4  ;;  %s3207_s22 = int_to_ptr.vmem [resolvable:$false] %s3206_s22 }
  0x96   : > { %s3208_s26 = scalar_lea.vmem %s3207_s22, 32  ;;  %p3209_p6 = scmp.lt.s32.totalorder %s830_s6, %s3207_s22 }
  0x97   : > { %p3204_p9 = pnand %p3202_p8, %p3657_p11  ;;  %p3210_p4 = scmp.lt.s32.totalorder %s3208_s26, %s3201_s18 }
  0x99   : > { %p3205_p10 = pneg %p3204_p9  ;;  %p3211_p12 = por %p3210_p4, %p3209_p6 }
  0x9b   : > { %p3212_p1 = pnand %p3211_p12, %p3205_p10 }
  0x9d   : > { %3215 = shalt.err (!%p3212_p1)
}
  0x9e   : > { %p4355_p13 = scmp.ne.s32.totalorder %s4342_s29, 0  ;;  %s4356_s17 = scalar_lea.sflag [#allocation14], %s3640_s3 }
  0x9f   : > { %s4357_s4 = sld [smem:[#allocation34_spill]]  ;;  %s683_s22 = scalar_lea.vmem [#allocation2], %s3630_s7 }
  0xa0   : > { %3005 = dma.hbm_to_vmem [thread:$0]  (!%p4355_p13), %s3747_s19, 16, %s830_s6, %s4356_s17  }
  0xa1   : > { %s690_s18 = sshll.u32 %s683_s22, 4  ;;  %s3778_s26 = sshll.u32 %s3630_s7, 4  ;;  %s691_s18 = int_to_ptr.vmem [resolvable:$true] %s690_s18 }
  0xa2   : > { %s681_s11 = scalar_lea.sflag [#allocation3], %s3630_s7 }
  0xa5   : > { %s4358_s2 = smov %s4357_s4  ;;  %s3774_s24 = scalar_lea.hbm %s4357_s4, %s3633_s28 }
  0xa6   : > { %s3216_s13 = scalar_lea.hbm %s3774_s24, 16  ;;  %s3221_s28 = scalar_lea.hbm %s4358_s2, 32 }
  0xa7   : > { %p3217_p12 = scmp.ne.s32.totalorder %s3774_s24, %s3216_s13  ;;  %p3222_p2 = scmp.lt.u32.totalorder %s3774_s24, %s4358_s2 }
  0xa8   : > { %p3223_p3 = scmp.lt.u32.totalorder %s3221_s28, %s3216_s13  ;;  %p3225_p8 = scmp.lt.u32.totalorder %s3216_s13, %s3774_s24 }
  0xa9   : > { %p3219_p0 = pnand %p3217_p12, %p3657_p11 }
  0xaa   : > { %p3224_p5 = por %p3223_p3, %p3222_p2 }
  0xab   : > { %p3220_p7 = pneg %p3219_p0 }
  0xac   : > { %p3226_p9 = por %p3225_p8, %p3224_p5 }
  0xae   : > { %p3227_p10 = pnand %p3226_p9, %p3220_p7 }
  0xb0   : > { %3230 = shalt.err (!%p3227_p10)
}
  0xb1   : > { %s3231_s1 = scalar_lea.vmem %s691_s18, 16  ;;  %s3456_s4 = smov [#allocation2]  }
  0xb2   : > { %p3232_p6 = scmp.ne.s32.totalorder %s691_s18, %s3231_s1  ;;  %s3236_s22 = sshll.u32 %s3456_s4, 4  ;;  %s3237_s22 = int_to_ptr.vmem [resolvable:$false] %s3236_s22 }
  0xb3   : > { %s3238_s19 = scalar_lea.vmem %s3237_s22, 32  ;;  %p3239_p12 = scmp.lt.s32.totalorder %s691_s18, %s3237_s22 }
  0xb4   : > { %p3234_p4 = pnand %p3232_p6, %p3657_p11  ;;  %p3240_p0 = scmp.lt.s32.totalorder %s3238_s19, %s3231_s1 }
  0xb6   : > { %p3235_p1 = pneg %p3234_p4  ;;  %p3241_p13 = por %p3240_p0, %p3239_p12 }
  0xb8   : > { %p3242_p2 = pnand %p3241_p13, %p3235_p1 }
  0xba   : > { %3245 = shalt.err (!%p3242_p2)
}
  0xbb   : > { %p4359_p3 = scmp.ne.s32.totalorder %s4342_s29, 0  ;;  %s3799_s13 = sshll.u32 %s3450_s25, 8 }
  0xbc   : > { %s726_s6 = scalar_lea.vmem [#allocation6], %s3778_s26  ;;  %s4360_s10 = sld [smem:[#allocation37_spill]] }
  0xbd   : > { %2984 = dma.hbm_to_vmem [thread:$0]  (!%p4359_p3), %s3774_s24, 16, %s691_s18, %s681_s11  }
  0xbe   : > { %s733_s28 = sshll.u32 %s726_s6, 4  ;;  %s3808_s28 = int_to_ptr.vmem [resolvable:$true] %s733_s28 }
  0xc2   : > { %s3806_s4 = scalar_lea.hbm %s4360_s10, %s3799_s13  ;;  %s3251_s18 = scalar_lea.hbm %s4360_s10, 512 }
  0xc3   : > { %s3246_s1 = scalar_lea.hbm %s3806_s4, 256  ;;  %p3252_p8 = scmp.lt.u32.totalorder %s3806_s4, %s4360_s10 }
  0xc4   : > { %p3247_p13 = scmp.ne.s32.totalorder %s3806_s4, %s3246_s1  ;;  %p3253_p9 = scmp.lt.u32.totalorder %s3251_s18, %s3246_s1 }
  0xc5   : > { %p3255_p6 = scmp.lt.u32.totalorder %s3246_s1, %s3806_s4 }
  0xc6   : > { %p3249_p7 = pnand %p3247_p13, %p3657_p11  ;;  %p3254_p10 = por %p3253_p9, %p3252_p8 }
  0xc8   : > { %p3250_p5 = pneg %p3249_p7  ;;  %p3256_p4 = por %p3255_p6, %p3254_p10 }
  0xca   : > { %p3257_p1 = pnand %p3256_p4, %p3250_p5 }
  0xcc   : > { %3260 = shalt.err (!%p3257_p1)
}
  0xcd   : > { %s3261_s6 = scalar_lea.vmem %s3808_s28, 256  ;;  %s3457_s17 = smov [#allocation6]  }
  0xce   : > { %p3262_p12 = scmp.ne.s32.totalorder %s3808_s28, %s3261_s6  ;;  %s3266_s9 = sshll.u32 %s3457_s17, 4  ;;  %s3267_s9 = int_to_ptr.vmem [resolvable:$false] %s3266_s9 }
  0xcf   : > { %s3268_s11 = scalar_lea.vmem %s3267_s9, 512  ;;  %p3269_p13 = scmp.lt.s32.totalorder %s3808_s28, %s3267_s9 }
  0xd0   : > { %p3264_p0 = pnand %p3262_p12, %p3657_p11  ;;  %p3270_p7 = scmp.lt.s32.totalorder %s3268_s11, %s3261_s6 }
  0xd2   : > { %p3265_p2 = pneg %p3264_p0  ;;  %p3271_p8 = por %p3270_p7, %p3269_p13 }
  0xd4   : > { %p3272_p9 = pnand %p3271_p8, %p3265_p2 }
  0xd6   : > { %3275 = shalt.err (!%p3272_p9)
}
  0xd7   : > { %s3458_s1 = smov 64   ;;  %s3459_s24 = smov 4  }
  0xd8   : > { %s4361_s18 = scalar_lea.sflag [#allocation5], %s3640_s3  ;;  %s4362_s12 = sld [smem:[#allocation39_spill]] }
  0xd9   : > { %2990 = dma.hbm_to_vmem [thread:$0]  (!%p4359_p3), %s3806_s4, 256, %s3808_s28, %s4361_s18, %s3458_s1, %s3458_s1, %s3459_s24  }
  0xda   : > { %s764_s17 = scalar_lea.vmem [#allocation9], %s3778_s26  ;;  %s3849_s10 = scalar_lea.hbm %s4294_s14, %s3799_s13 }
  0xdb   : > { %s771_s9 = sshll.u32 %s764_s17, 4  ;;  %s3843_s9 = int_to_ptr.vmem [resolvable:$true] %s771_s9 }
  0xde   : > { %s3840_s6 = scalar_lea.hbm %s4362_s12, %s3799_s13  ;;  %s3281_s18 = scalar_lea.hbm %s4362_s12, 512 }
  0xdf   : > { %s3276_s15 = scalar_lea.hbm %s3840_s6, 256  ;;  %p3282_p4 = scmp.lt.u32.totalorder %s3840_s6, %s4362_s12 }
  0xe0   : > { %p3277_p5 = scmp.ne.s32.totalorder %s3840_s6, %s3276_s15  ;;  %p3283_p1 = scmp.lt.u32.totalorder %s3281_s18, %s3276_s15 }
  0xe1   : > { %p3285_p0 = scmp.lt.u32.totalorder %s3276_s15, %s3840_s6 }
  0xe2   : > { %p3279_p10 = pnand %p3277_p5, %p3657_p11  ;;  %p3284_p12 = por %p3283_p1, %p3282_p4 }
  0xe4   : > { %p3280_p6 = pneg %p3279_p10  ;;  %p3286_p2 = por %p3285_p0, %p3284_p12 }
  0xe6   : > { %p3287_p13 = pnand %p3286_p2, %p3280_p6 }
  0xe8   : > { %3290 = shalt.err (!%p3287_p13)
}
  0xe9   : > { %s3291_s2 = scalar_lea.vmem %s3843_s9, 256  ;;  %s3460_s13 = smov [#allocation9]  }
  0xea   : > { %p3292_p7 = scmp.ne.s32.totalorder %s3843_s9, %s3291_s2  ;;  %s3296_s17 = sshll.u32 %s3460_s13, 4  ;;  %s3297_s17 = int_to_ptr.vmem [resolvable:$false] %s3296_s17 }
  0xeb   : > { %s3298_s11 = scalar_lea.vmem %s3297_s17, 512  ;;  %p3299_p5 = scmp.lt.s32.totalorder %s3843_s9, %s3297_s17 }
  0xec   : > { %p3294_p8 = pnand %p3292_p7, %p3657_p11  ;;  %p3300_p10 = scmp.lt.s32.totalorder %s3298_s11, %s3291_s2 }
  0xee   : > { %p3295_p9 = pneg %p3294_p8  ;;  %p3301_p4 = por %p3300_p10, %p3299_p5 }
  0xf0   : > { %p3302_p1 = pnand %p3301_p4, %p3295_p9 }
  0xf2   : > { %3305 = shalt.err (!%p3302_p1)
}
  0xf3   : > { %s4363_s15 = scalar_lea.sflag [#allocation8], %s3640_s3  ;;  %s802_s28 = scalar_lea.vmem [#allocation12], %s3778_s26 }
  0xf4   : > { %2996 = dma.hbm_to_vmem [thread:$0]  (!%p4359_p3), %s3840_s6, 256, %s3843_s9, %s4363_s15, %s3458_s1, %s3458_s1, %s3459_s24  }
  0xf5   : > { %s809_s4 = sshll.u32 %s802_s28, 4  ;;  %s2705_s18 = sshll.u32 %s3630_s7, 1  ;;  %s3879_s4 = int_to_ptr.vmem [resolvable:$true] %s809_s4 }
  0xf6   : > { %s3306_s22 = scalar_lea.hbm %s3849_s10, 256  ;;  %s3311_s13 = scalar_lea.hbm %s4294_s14, 512 }
  0xf7   : > { %p3307_p6 = scmp.ne.s32.totalorder %s3849_s10, %s3306_s22  ;;  %p3312_p2 = scmp.lt.u32.totalorder %s3849_s10, %s4294_s14 }
  0xf8   : > { %p3313_p13 = scmp.lt.u32.totalorder %s3311_s13, %s3306_s22  ;;  %p3315_p8 = scmp.lt.u32.totalorder %s3306_s22, %s3849_s10 }
  0xf9   : > { %p3309_p12 = pnand %p3307_p6, %p3657_p11 }
  0xfa   : > { %p3314_p7 = por %p3313_p13, %p3312_p2 }
  0xfb   : > { %p3310_p0 = pneg %p3309_p12 }
  0xfc   : > { %p3316_p9 = por %p3315_p8, %p3314_p7 }
  0xfe   : > { %p3317_p5 = pnand %p3316_p9, %p3310_p0 }
 0x100   : > { %3320 = shalt.err (!%p3317_p5)
}
 0x101   : > { %s3321_s26 = scalar_lea.vmem %s3879_s4, 256  ;;  %s3461_s6 = smov [#allocation12]  }
 0x102   : > { %p3322_p10 = scmp.ne.s32.totalorder %s3879_s4, %s3321_s26  ;;  %s3326_s9 = sshll.u32 %s3461_s6, 4  ;;  %s3327_s9 = int_to_ptr.vmem [resolvable:$false] %s3326_s9 }
 0x103   : > { %s3328_s15 = scalar_lea.vmem %s3327_s9, 512  ;;  %p3329_p6 = scmp.lt.s32.totalorder %s3879_s4, %s3327_s9 }
 0x104   : > { %p3324_p4 = pnand %p3322_p10, %p3657_p11  ;;  %p3330_p12 = scmp.lt.s32.totalorder %s3328_s15, %s3321_s26 }
 0x106   : > { %p3325_p1 = pneg %p3324_p4  ;;  %p3331_p2 = por %p3330_p12, %p3329_p6 }
 0x108   : > { %p3332_p13 = pnand %p3331_p2, %p3325_p1 }
 0x10a   : > { %3335 = shalt.err (!%p3332_p13)
}
 0x10b   : > { %s4364_s28 = scalar_lea.sflag [#allocation11], %s3640_s3  ;;  %s2796_s22 = sshll.u32 %s3450_s25, 5 }
 0x10c   : > { %3002 = dma.hbm_to_vmem [thread:$0]  (!%p4359_p3), %s3849_s10, 256, %s3879_s4, %s4364_s28, %s3458_s1, %s3458_s1, %s3459_s24  }
 0x10d   : > { %s869_s19 = scalar_lea.vmem [#allocation15], %s2705_s18  ;;  %s3915_s11 = scalar_lea.hbm %s4300_s20, %s2796_s22 }
 0x10e   : > { %s876_s2 = sshll.u32 %s869_s19, 4  ;;  %s3336_s26 = scalar_lea.hbm %s3915_s11, 32  ;;  %s3917_s2 = int_to_ptr.vmem [resolvable:$true] %s876_s2 }
 0x10f   : > { %p3337_p0 = scmp.ne.s32.totalorder %s3915_s11, %s3336_s26  ;;  %s3341_s24 = scalar_lea.hbm %s4300_s20, 64 }
 0x110   : > { %p3342_p9 = scmp.lt.u32.totalorder %s3915_s11, %s4300_s20  ;;  %p3343_p5 = scmp.lt.u32.totalorder %s3341_s24, %s3336_s26 }
 0x111   : > { %p3339_p7 = pnand %p3337_p0, %p3657_p11  ;;  %p3345_p4 = scmp.lt.u32.totalorder %s3336_s26, %s3915_s11 }
 0x112   : > { %p3344_p10 = por %p3343_p5, %p3342_p9 }
 0x113   : > { %p3340_p8 = pneg %p3339_p7 }
 0x114   : > { %p3346_p1 = por %p3345_p4, %p3344_p10 }
 0x116   : > { %p3347_p6 = pnand %p3346_p1, %p3340_p8 }
 0x118   : > { %3350 = shalt.err (!%p3347_p6)
}
 0x119   : > { %s3351_s9 = scalar_lea.vmem %s3917_s2, 32  ;;  %s3462_s15 = smov [#allocation15]  }
 0x11a   : > { %p3352_p12 = scmp.ne.s32.totalorder %s3917_s2, %s3351_s9  ;;  %s3356_s28 = sshll.u32 %s3462_s15, 4  ;;  %s3357_s28 = int_to_ptr.vmem [resolvable:$false] %s3356_s28 }
 0x11b   : > { %s3358_s19 = scalar_lea.vmem %s3357_s28, 64  ;;  %p3359_p0 = scmp.lt.s32.totalorder %s3917_s2, %s3357_s28 }
 0x11c   : > { %p3354_p2 = pnand %p3352_p12, %p3657_p11  ;;  %p3360_p7 = scmp.lt.s32.totalorder %s3358_s19, %s3351_s9 }
 0x11e   : > { %p3355_p13 = pneg %p3354_p2  ;;  %p3361_p9 = por %p3360_p7, %p3359_p0 }
 0x120   : > { %p3362_p5 = pnand %p3361_p9, %p3355_p13 }
 0x122   : > { %3365 = shalt.err (!%p3362_p5)
}
 0x123   : > { %s3463_s13 = smov 16   ;;  %s3464_s17 = smov 1  }
 0x124   : > { %s4365_s26 = scalar_lea.sflag [#allocation14], %s3640_s3  ;;  %s3950_s24 = scalar_lea.hbm %s4301_s21, %s2796_s22 }
 0x125   : > { %3008 = dma.hbm_to_vmem [thread:$0]  (!%p4359_p3), %s3915_s11, 32, %s3917_s2, %s4365_s26, %s3463_s13, %s3463_s13, %s3464_s17  }
 0x126   : > { %s890_s4 = scalar_lea.vmem [#allocation16], %s2705_s18  ;;  %s887_s9 = scalar_lea.sflag [#allocation17], %s3630_s7 }
 0x127   : > { %s897_s6 = sshll.u32 %s890_s4, 4  ;;  %s3366_s15 = scalar_lea.hbm %s3950_s24, 32  ;;  %s3954_s6 = int_to_ptr.vmem [resolvable:$true] %s897_s6 }
 0x128   : > { %p3367_p8 = scmp.ne.s32.totalorder %s3950_s24, %s3366_s15  ;;  %s3371_s22 = scalar_lea.hbm %s4301_s21, 64 }
 0x129   : > { %p3372_p1 = scmp.lt.u32.totalorder %s3950_s24, %s4301_s21  ;;  %p3373_p6 = scmp.lt.u32.totalorder %s3371_s22, %s3366_s15 }
 0x12a   : > { %p3369_p10 = pnand %p3367_p8, %p3657_p11  ;;  %p3375_p2 = scmp.lt.u32.totalorder %s3366_s15, %s3950_s24 }
 0x12b   : > { %p3374_p12 = por %p3373_p6, %p3372_p1 }
 0x12c   : > { %p3370_p4 = pneg %p3369_p10 }
 0x12d   : > { %p3376_p13 = por %p3375_p2, %p3374_p12 }
 0x12f   : > { %p3377_p0 = pnand %p3376_p13, %p3370_p4 }
 0x131   : > { %3380 = shalt.err (!%p3377_p0)
}
 0x132   : > { %s3381_s18 = scalar_lea.vmem %s3954_s6, 32  ;;  %s3465_s28 = smov [#allocation16]  }
 0x133   : > { %p3382_p7 = scmp.ne.s32.totalorder %s3954_s6, %s3381_s18  ;;  %s3386_s19 = sshll.u32 %s3465_s28, 4  ;;  %s3387_s19 = int_to_ptr.vmem [resolvable:$false] %s3386_s19 }
 0x134   : > { %s3388_s26 = scalar_lea.vmem %s3387_s19, 64  ;;  %p3389_p8 = scmp.lt.s32.totalorder %s3954_s6, %s3387_s19 }
 0x135   : > { %p3384_p9 = pnand %p3382_p7, %p3657_p11  ;;  %p3390_p10 = scmp.lt.s32.totalorder %s3388_s26, %s3381_s18 }
 0x137   : > { %p3385_p5 = pneg %p3384_p9  ;;  %p3391_p1 = por %p3390_p10, %p3389_p8 }
 0x139   : > { %p3392_p6 = pnand %p3391_p1, %p3385_p5 }
 0x13b   : > { %3395 = shalt.err (!%p3392_p6)
}
 0x13c   : > { %3011 = dma.hbm_to_vmem [thread:$0]  (!%p4359_p3), %s3950_s24, 32, %s3954_s6, %s887_s9, %s3463_s13, %s3463_s13, %s3464_s17  }
 0x13d   : > { %p4366_p11 = scmp.ne.s32.totalorder %s4348_s0, 0 }
 0x13e   : > { %s3986_s23 = sand.u32 (!%p4366_p11), 1, %s3442_s30   ;;  %p4367_p4 = scmp.ne.s32.totalorder (!%p4366_p11), %s4341_s27, 0 }
 0x13f   : > { %909 = sbr.rel (%p4366_p11) target bundleno = 3555 (0xde3), region = 108  ;;  %s912_s10 = scalar_lea.sflag (!%p4366_p11), [#allocation3], %s3986_s23 }
 0x146   : > { %3413 = dma.done.wait (%p4367_p4), %s912_s10, 16  }
 0x147   : > { %3415 = vsyncadd (%p4367_p4), %s912_s10, 4294967280  ;;  %s919_s7 = sand.u32 1, %s3608_s5  }
 0x148   : > { %s920_s29 = scalar_lea.sflag [#allocation5], %s919_s7 }
 0x149   : > { %3417 = dma.done.wait (%p4367_p4), %s920_s29, 272  }
 0x14a   : > { %3419 = vsyncadd (%p4367_p4), %s920_s29, 4294967024  ;;  %s4001_s13 = sshll.u32 %s3986_s23, 4  ;;  %s937_s24 = scalar_lea.sflag [#allocation8], %s919_s7 }
 0x14b   : > { %3421 = dma.done.wait (%p4367_p4), %s937_s24, 272  }
 0x14c   : > { %3423 = vsyncadd (%p4367_p4), %s937_s24, 4294967024  ;;  %s954_s9 = scalar_lea.sflag [#allocation11], %s919_s7 }
 0x14d   : > { %3425 = dma.done.wait (%p4367_p4), %s954_s9, 272  }
 0x14e   : > { %3427 = vsyncadd (%p4367_p4), %s954_s9, 4294967024  ;;  %s971_s3 = scalar_lea.sflag [#allocation14], %s919_s7 }
 0x14f   : > { %3429 = dma.done.wait (%p4367_p4), %s971_s3, 48  }
 0x150   : > { %3431 = vsyncadd (%p4367_p4), %s971_s3, 4294967248  ;;  %s2715_s2 = sshll.u32 %s3986_s23, 1  ;;  %s988_s18 = scalar_lea.sflag [#allocation17], %s3986_s23 }
 0x151   : > { %s4022_s11 = scalar_lea.vmem [#allocation15], %s2715_s2  ;;  %s4025_s28 = scalar_lea.vmem [#allocation16], %s2715_s2 }
 0x152   : > { %3433 = dma.done.wait (%p4367_p4), %s988_s18, 32  }
 0x153   : > { %3435 = vsyncadd (%p4367_p4), %s988_s18, 4294967264  ;;  %p1116_p3 = scmp.lt.s32.totalorder %s3608_s5, 1  ;;  %s4368_s24 = sld [smem:[#allocation33_spill]] }
 0x154   : > { %s4369_s8 = sld [smem:[#allocation35_spill]]  ;;  %s4370_s6 = sld [smem:[#allocation42_spill]] }
 0x155   : > { %s1117_s19 = scalar_select %p1116_p3, %s3608_s5, 1 }
 0x156   : > { %s4371_s7 = sld [smem:[#allocation44_spill]]  ;;  %p2726_p12 = scmp.ne.s32.totalorder %s3608_s5, 0 }
 0x157   : > { %s2798_s26 = sshll.u32 %s1117_s19, 4  ;;  %s2721_s10 = sshll.u32 %s1117_s19, 1  ;;  %vm1149_vm0 = vcmask (!%p2726_p12), 254976   ;;  %vm1153_vm1 = vcmask (!%p2726_p12), 261120  }
 0x158   : > { %s4044_s27 = scalar_lea.vmem %s4296_s16, %s2721_s10  ;;  %s2800_s1 = sshll.u32 %s1117_s19, 5 }
 0x159   : > { %s1120_s9 = scalar_lea.vmem %s4368_s24, %s2798_s26  ;;  %s4374_s19 = sld [smem:[#allocation28_spill]] (!%p2726_p12) }
 0x15a   : > { %s4039_s2 = scalar_lea.vmem %s4369_s8, %s2798_s26  ;;  %s4049_s0 = scalar_lea.vmem %s4370_s6, %s2721_s10 }
 0x15b   : > { %s4372_s26 = sld [smem:[#allocation43_spill]]  ;;  %1147 = sbr.rel (%p2726_p12) target bundleno = 357 (0x165), region = 152 }
 0x15c   : > { %s4054_s29 = scalar_lea.vmem %s4371_s7, %s2721_s10  ;;  %s4373_s8 = sld [smem:[#allocation27_spill]] (!%p2726_p12) }
 0x15d   : > { %s4375_s18 = sld [smem:[#allocation45_spill]] (!%p2726_p12)  ;;  %s4376_s24 = sld [smem:[#allocation46_spill]] (!%p2726_p12) }
 0x15f   : > { %v1151_v1 = vld [vmem:[%s4374_s19] sm:$0xff] (!%p2726_p12)  ;;  %v1152_v2 = vld [vmem:[%s4374_s19 + $0x8] sm:$0xff] (!%p2726_p12) }
 0x161   : > { %s4059_s3 = scalar_lea.vmem %s4372_s26, %s2800_s1 }
 0x162   : > { %v1148_v0 = vld [vmem:[%s4373_s8] sm:$0x3] }
 0x163   : > { %1150 = vst.msk [vmem:[%s4375_s18] sm:$0x3] %vm1149_vm0, %v1148_v0 }
 0x164   : > { %1154 = vst.msk [vmem:[%s4376_s24] sm:$0xff] %vm1153_vm1, %v1151_v1  ;;  %1155 = vst.msk [vmem:[%s4376_s24 + $0x8] sm:$0xff] %vm1153_vm1, %v1152_v2 }
 0x165 PF: > { %v3052_v3 = vld [vmem:[%s1120_s9] sm:$0xff]   ;;  %v3466_v4 = vmov 0.0   ;;  %v3053_v5 = vld [vmem:[%s1120_s9 + $0x8] sm:$0xff]   ;;  %vm3467_vm2 = vmmov 0   ;;  %s4377_s25 = sld [smem:[#allocation45_spill]]  ;;  %vm1186_vm3 = vcmask 261120  }
 0x166   : > { %2846 = vmatprep.subr.bf16.mxu1 %v3466_v4  ;;  %2862 = vmatprep.subr.bf16.mxu0 %v3466_v4  ;;  %v3054_v8 = vld [vmem:[%s4039_s2] sm:$0xff]   ;;  %v3055_v9 = vld [vmem:[%s4039_s2 + $0x8] sm:$0xff]   ;;  %s4378_s6 = sld [smem:[#allocation46_spill]]  ;;  %s4379_s1 = sld [smem:[#allocation29_spill]]  ;;  %vm1362_vm4 = vcmask 15360   ;;  %vm1369_vm5 = vcmask 1041408  }
 0x167   : > { %2847 = vmatpush3.bf16.msra.mxu1 %v3052_v3  ;;  %2850 = vmatprep.mubr.msk.bf16.mxu1 %vm3467_vm2, %v3466_v4  ;;  %s4380_s18 = scalar_lea.vmem [#allocation6], %s4001_s13  ;;  %s4382_s22 = sld [smem:[#allocation31_spill]]  ;;  %v3468_v44 = vmov 0.0|0.0   ;;  %vm1535_vm6 = vcmask 31744   ;;  %vm1551_vm7 = vcmask 130048   ;;  %vm1713_vm8 = vcmask 1043456  }
 0x168   : > { %2848 = vmatprep.subr.bf16.mxu1 %v3466_v4  ;;  %2866 = vmatprep.mubr.msk.bf16.mxu0 %vm3467_vm2, %v3466_v4  ;;  %v3056_v14 = vld [vmem:[%s4380_s18] sm:$0xff]   ;;  %s4381_s5 = smov %s4380_s18  ;;  %s4383_s15 = scalar_lea.vmem [#allocation2], %s3986_s23  ;;  %vm1934_vm9 = vcmask 254976  }
 0x169   : > { %2863 = vmatpush3.bf16.msra.mxu0 %v3056_v14  ;;  %v3057_v15 = vld [vmem:[%s4381_s5 + $0x8] sm:$0xff]   ;;  %v2727_v19 = vld [vmem:[%s4383_s15] ss:$0 sm:$0xff]  ;;  %s4384_s18 = scalar_lea.vmem [#allocation4], %s3986_s23  ;;  %s4385_s24 = sld [smem:[#allocation30_spill]] }
 0x16a   : > { %2864 = vmatprep.subr.bf16.mxu0 %v3466_v4  ;;  %v2731_v37 = vld [vmem:[%s4384_s18] ss:$0 sm:$0xff]  ;;  %s4386_s15 = sld [smem:[#allocation32_spill]]  ;;  %s4387_s9 = scalar_lea.vmem [#allocation9], %s4001_s13 }
 0x16b   : > { %v4087_v6 = vld [vmem:[%s4377_s25] sm:$0x3]  ;;  %2849 = vmatpush3.bf16.msra.mxu1 %v3053_v5  ;;  %v3058_v14 = vld [vmem:[%s4387_s9] sm:$0xff]   ;;  %s4388_s4 = scalar_lea.vmem [#allocation7], %s3986_s23  ;;  %s4389_s12 = smov %s4387_s9 }
 0x16c   : > { %v4094_v7 = vpack.c.bf16 %v4087_v6, %v4087_v6  ;;  %2854 = vmatprep.subr.bf16.mxu1 %v3466_v4  ;;  %v4102_v10 = vld [vmem:[%s4378_s6] sm:$0xff]  ;;  %v4107_v11 = vld [vmem:[%s4378_s6 + $0x8] sm:$0xff]  ;;  %s4390_s17 = scalar_lea.vmem [#allocation12], %s4001_s13  ;;  %s4392_s10 = scalar_lea.vmem [#allocation10], %s3986_s23 }
 0x16d   : > { %v1235_v12 = vpack.c.bf16 %v4107_v11, %v4102_v10  ;;  %v4120_v13 = vld [vmem:[%s4379_s1] sm:$0xff]  ;;  %2865 = vmatpush3.bf16.msra.mxu0 %v3057_v15  ;;  %v1451_v17 = vld [vmem:[%s4382_s22 + $0x8] sm:$0xff]  ;;  %v1452_v30 = vld [vmem:[%s4382_s22 + $0x10] sm:$0xff]  ;;  %s4391_s2 = smov %s4390_s17  ;;  %s4393_s13 = scalar_lea.vmem [#allocation13], %s3986_s23 }
 0x16e   : > { %2851 = vmatmul.mubr.msk.bf16.vlgmr.msra.gmra.mrb[0].mxu1 %vm1186_vm3, %v4094_v7  ;;  %v1450_v16 = vld [vmem:[%s4382_s22] sm:$0xff]  ;;  %v4141_v24 = vld [vmem:[%s4379_s1 + $0x8] sm:$0xff]  ;;  %v1453_v31 = vld [vmem:[%s4382_s22 + $0x18] sm:$0xff] }
 0x16f   : > { %2855 = vmatpush3.bf16.msra.mxu1 %v3054_v8  ;;  %2858 = vmatprep.mubr.msk.bf16.mxu1 %vm3467_vm2, %v3466_v4  ;;  %v2947_v18 = vpack.c.bf16 %v1451_v17, %v1450_v16  ;;  %v2951_v32 = vpack.c.bf16 %v1453_v31, %v1452_v30  ;;  %v1161_v63 = vld [vmem:[%s4385_s24] sm:$0x3] }
 0x170   : > { %2856 = vmatprep.subr.bf16.mxu1 %v3466_v4  ;;  %2867 = vmatmul.mubr.msk.bf16.vlgmr.msra.gmra.mrb[0].mxu0 %vm1186_vm3, %v1235_v12  ;;  %v1706_v3 = vld [vmem:[%s4386_s15] sm:$0xf] }
 0x171   : > { %2948 = vmatprep.subr.bf16.mxu0 %v2947_v18  ;;  %v2735_v15 = vld [vmem:[%s4388_s4] ss:$0 sm:$0xff] }
 0x172   : > { %2950 = vmatpush3.bf16.msra.mxu0 %v2947_v18  ;;  %v2752_v30 = vld [vmem:[%s4392_s10] ss:$0 sm:$0xff] }
 0x173   : > { %2857 = vmatpush3.bf16.msra.mxu1 %v3055_v9  ;;  %2952 = vmatprep.subr.bf16.mxu0 %v2951_v32 }
 0x176   : > { %2859 = vmatmul.mubr.msk.bf16.vlgmr.msra.gmra.mrb[4].mxu1 %vm1186_vm3, %v1235_v12  ;;  %2954 = vmatpush3.bf16.msra.mxu0 %v2951_v32 }
 0x177   : > { %2872 = vmatprep.mubr.msk.f32.mxu1 %vm1362_vm4, %v4120_v13  ;;  %2898 = vmatprep.subr.msk.mxu0 %vm1713_vm8, %v1706_v3 }
 0x241   : > { %v1224_v20 = vpop.f32.mrb[0].mxu1 }
 0x242   : > { %v1225_v21 = vadd.f32 %v2727_v19, %v1224_v20  ;;  %v2852_v22 = vpop.f32.mrb[1].mxu1 }
 0x243   : > { %v1227_v23 = vpop.f32.mrb[2].mxu1  ;;  %v4155_v33 = vpop.f32.mrb[0].mxu0 }
 0x244   : > { %v2853_v25 = vpop.f32.mrb[3].mxu1  ;;  %2870 = vmatprep.subr.msk.mxu1 %vm1369_vm5, %v1225_v21  ;;  %v2868_v34 = vpop.f32.mrb[1].mxu0  ;;  %v1356_v17 = vadd.f32 %v2735_v15, %v4155_v33  ;;  %v3059_v23 = vld [vmem:[%s4389_s12 + $0x8] sm:$0xff]  }
 0x245   : > { %2871 = vmatpush3.msk.msra.mxu1 %vm1369_vm5, %v1225_v21  ;;  %v4157_v35 = vpop.f32.mrb[2].mxu0 }
 0x246   : > { %2873 = vmatmul.mubr.msk.f32.vlgmr.msra.gmra.mrb[8].mxu1 %vm1362_vm4, %v4141_v24  ;;  %v2869_v36 = vpop.f32.mrb[3].mxu0  ;;  %2955 = vmatprep.subr.bf16.mxu1 %v3468_v44  ;;  %v1359_v16 = vadd.f32 %v2735_v15, %v4157_v35 }
 0x247   : > { %2890 = vmatprep.mubr.msk.f32.mxu1 %vm3467_vm2, %v3466_v4 }
 0x249   : > { %v1291_v26 = vpop.f32.mrb[4].mxu1 }
 0x24a   : > { %v2860_v27 = vpop.f32.mrb[5].mxu1  ;;  %v1292_v39 = vadd.f32 %v2731_v37, %v1291_v26 }
 0x24b   : > { %v1294_v28 = vpop.f32.mrb[6].mxu1 }
 0x24c   : > { %v2861_v29 = vpop.f32.mrb[7].mxu1  ;;  %v1295_v38 = vadd.f32 %v2731_v37, %v1294_v28  ;;  %v3060_v28 = vld [vmem:[%s4390_s17] sm:$0xff]  }
 0x24d   : > { %v3061_v29 = vld [vmem:[%s4391_s2 + $0x8] sm:$0xff]  }
 0x319   : > { %v2874_v40 = vpop.f32.mrb[8].mxu1 }
 0x31a   : > { %v1449_v41 = vmul.f32 %v2874_v40, %v1295_v38  ;;  %v1439_v42 = vpop.f32.mrb[9].mxu1 }
 0x31b   : > { %v1448_v43 = vmul.f32 %v1439_v42, %v1292_v39  ;;  %v3062_v42 = vld [vmem:[%s4059_s3] sm:$0xff]  }
 0x31d   : > { %2883 = vmatprep.mubr.msk.f32.mxu0 %vm1186_vm3, %v1448_v43  ;;  %v3063_v43 = vld [vmem:[%s4059_s3 + $0x8] sm:$0xff]  }
 0x31e   : > { %2884 = vmatmul.mubr.msk.f32.vlgmr.msra.gmra.mrb[4].mxu0 %vm1186_vm3, %v1449_v41 }
 0x31f   : > { %2899 = vmatpush3.msk.msra.mxu0 %vm1713_vm8, %v1706_v3 }
 0x320   : > { %2910 = vmatprep.subr.bf16.mxu0 %v3466_v4 }
 0x3f1   : > { %v2885_v45 = vpop.f32.mrb[4].mxu0 }
 0x3f2   : > { %v1537_v46 = vsel %vm1535_vm6, %v2885_v45, -inf  ;;  %v1526_v47 = vpop.f32.mrb[5].mxu0 }
 0x3f3   : > { %v1536_v48 = vsel %vm1535_vm6, %v1526_v47, -inf }
 0x3f4   : > { %v1538_v49 = vmax.f32 %v1536_v48, %v1537_v46 }
 0x3f6   : > { %v1539_v50 = vrot.slane %v1538_v49, 4 }
 0x3f8   : > { %v1540_v51 = vmax.f32 %v1538_v49, %v1539_v50 }
 0x3fa   : > { %v1541_v52 = vrot.slane %v1540_v51, 2 }
 0x3fc   : > { %v1542_v53 = vmax.f32 %v1540_v51, %v1541_v52 }
 0x3fe   : > { %v1543_v54 = vrot.slane %v1542_v53, 1 }
 0x400   : > { %v1544_v55 = vmax.f32 %v1542_v53, %v1543_v54  ;;  %v2756_v53 = vld [vmem:[%s4044_s27] ss:$0 sm:$0xff] }
 0x402   : > { %v1545_v56 = vsub.f32 %v1526_v47, %v1544_v55  ;;  %v1546_v57 = vsub.f32 %v2885_v45, %v1544_v55  ;;  %v2757_v55 = vld [vmem:[%s4049_s0] ss:$0 sm:$0xff] }
 0x404   : > { %v1547_v58 = vmul.f32 1.442695, %v1545_v56  ;;  %v1549_v59 = vmul.f32 1.442695, %v1546_v57 }
 0x406   : > { %3066 = vpow2.f32 %v1547_v58 }
 0x407   : > { %3068 = vpow2.f32 %v1549_v59 }
 0x410   : > { %v3067_v60 = vpop.eup %3066 }
 0x411   : > { %v3069_v61 = vpop.eup %3068 }
 0x412   : > { %v2956_v62 = vpack.c.bf16 %v3069_v61, %v3067_v60 }
 0x414   : > { %2957 = vmatpush3.bf16.msra.mxu1 %v2956_v62 }
 0x417   : > { %2891 = vmatmul.mubr.msk.f32.vlgmr.msra.gmra.mrb[10].mxu1 %vm1551_vm7, %v1161_v63 }
 0x418   : > { %2895 = vmatprep.mubr.msk.f32.mxu1 %vm1362_vm4, %v4120_v13 }
 0x4ea   : > { %v1621_v0 = vpop.f32.mrb[10].mxu1 }
 0x4eb   : > { %3070 = vrcp.f32 %v1621_v0  ;;  %v2892_v1 = vpop.f32.mrb[11].mxu1 }
 0x4f5   : > { %v3071_v2 = vpop.eup %3070 }
 0x4f6   : > { %2893 = vmatprep.subr.msk.mxu1 %vm1369_vm5, %v3071_v2 }
 0x4f7   : > { %2894 = vmatpush3.msk.msra.mxu1 %vm1369_vm5, %v3071_v2 }
 0x4f8   : > { %2896 = vmatmul.mubr.msk.f32.vlgmr.msra.gmra.mrb[12].mxu1 %vm1362_vm4, %v4141_v24  ;;  %2958 = vmatprep.subr.bf16.mxu1 %v3468_v44 }
 0x4f9   : > { %2907 = vmatprep.mubr.msk.f32.mxu1 %vm3467_vm2, %v3466_v4 }
 0x5cb   : > { %v2897_v5 = vpop.f32.mrb[12].mxu1 }
 0x5cc   : > { %v1695_v8 = vpop.f32.mrb[13].mxu1  ;;  %v1705_v12 = vmul.f32 %v3069_v61, %v2897_v5 }
 0x5cd   : > { %v1704_v9 = vmul.f32 %v3067_v60, %v1695_v8 }
 0x5cf   : > { %2900 = vmatprep.mubr.msk.f32.mxu0 %vm1535_vm6, %v1704_v9 }
 0x5d0   : > { %2901 = vmatmul.mubr.msk.f32.vlgmr.msra.gmra.mrb[6].mxu0 %vm1535_vm6, %v1705_v12 }
 0x5d1   : > { %2914 = vmatprep.mubr.msk.bf16.mxu0 %vm3467_vm2, %v3466_v4  ;;  %2911 = vmatpush3.bf16.msra.mxu0 %v3058_v14 }
 0x5d2   : > { %2912 = vmatprep.subr.bf16.mxu0 %v3466_v4 }
 0x5d5   : > { %2913 = vmatpush3.bf16.msra.mxu0 %v3059_v23 }
 0x5d6   : > { %2926 = vmatprep.subr.bf16.mxu0 %v3466_v4 }
 0x6a3   : > { %v2902_v18 = vpop.f32.mrb[6].mxu0 }
 0x6a4   : > { %v1793_v19 = vmul.f32 %v2902_v18, %v1359_v16  ;;  %v1783_v20 = vpop.f32.mrb[7].mxu0 }
 0x6a5   : > { %v1792_v21 = vmul.f32 %v1783_v20, %v1356_v17 }
 0x6a7   : > { %v2959_v22 = vpack.c.bf16 %v1793_v19, %v1792_v21  ;;  %v3064_v21 = vld [vmem:[%s4059_s3 + $0x10] sm:$0xff]  }
 0x6a9   : > { %2960 = vmatpush3.bf16.msra.mxu1 %v2959_v22  ;;  %v3065_v22 = vld [vmem:[%s4059_s3 + $0x18] sm:$0xff]  }
 0x6aa   : > { %2918 = vmatprep.subr.bf16.mxu1 %v3466_v4 }
 0x6ac   : > { %2908 = vmatmul.mubr.msk.f32.vlgmr.msra.gmra.mrb[14].mxu1 %vm1551_vm7, %v1161_v63 }
 0x6ad   : > { %2922 = vmatprep.mubr.msk.bf16.mxu1 %vm3467_vm2, %v3466_v4  ;;  %2919 = vmatpush3.bf16.msra.mxu1 %v3062_v42 }
 0x6ae   : > { %2920 = vmatprep.subr.bf16.mxu1 %v3466_v4 }
 0x6b1   : > { %2921 = vmatpush3.bf16.msra.mxu1 %v3063_v43 }
 0x77f   : > { %v1860_v25 = vpop.f32.mrb[14].mxu1 }
 0x780   : > { %v1869_v26 = vpack.c.bf16 %v1860_v25, %v1860_v25  ;;  %v2909_v27 = vpop.f32.mrb[15].mxu1 }
 0x782   : > { %2915 = vmatmul.mubr.msk.bf16.vlgmr.msra.gmra.mrb[8].mxu0 %vm1186_vm3, %v1869_v26 }
 0x783   : > { %2930 = vmatprep.mubr.msk.bf16.mxu0 %vm3467_vm2, %v3466_v4  ;;  %2927 = vmatpush3.bf16.msra.mxu0 %v3060_v28 }
 0x784   : > { %2928 = vmatprep.subr.bf16.mxu0 %v3466_v4 }
 0x787   : > { %2929 = vmatpush3.bf16.msra.mxu0 %v3061_v29 }
 0x788   : > { %2939 = vmatprep.subr.bf16.mxu0 %v3466_v4 }
 0x78a   : > { %2931 = vmatmul.mubr.msk.bf16.vlgmr.msra.gmra.mrb[12].mxu0 %vm1186_vm3, %v4094_v7 }
 0x78b   : > { %2943 = vmatprep.mubr.msk.bf16.mxu0 %vm3467_vm2, %v3466_v4  ;;  %2940 = vmatpush3.bf16.msra.mxu0 %v3064_v21 }
 0x78c   : > { %2941 = vmatprep.subr.bf16.mxu0 %v3466_v4 }
 0x78f   : > { %2942 = vmatpush3.bf16.msra.mxu0 %v3065_v22 }
 0x855   : > { %v1925_v31 = vpop.f32.mrb[8].mxu0 }
 0x856   : > { %v1926_v32 = vadd.f32 %v2752_v30, %v1925_v31  ;;  %v2916_v33 = vpop.f32.mrb[9].mxu0 }
 0x857   : > { %v1928_v34 = vpop.f32.mrb[10].mxu0 }
 0x858   : > { %v1931_v35 = vadd.f32 %v1926_v32, %v4087_v6  ;;  %v2917_v36 = vpop.f32.mrb[11].mxu0  ;;  %v2765_v6 = vld [vmem:[%s4393_s13] ss:$0 sm:$0xff]  ;;  %v2774_v32 = vld [vmem:[%s4044_s27 + $0x1] ss:$0 sm:$0xff] }
 0x859   : > { %v2775_v36 = vld [vmem:[%s4049_s0 + $0x1] ss:$0 sm:$0xff] }
 0x85a   : > { %v1935_v37 = vsel %vm1934_vm9, %v1931_v35, 0.0 }
 0x85b   : > { %1936 = vadd.xlane.f32.xlu0 %v1935_v37 }
 0x85d   : > { %v2124_v44 = vpop.f32.mrb[12].mxu0 }
 0x85e   : > { %v2125_v45 = vadd.f32 %v2765_v6, %v2124_v44  ;;  %v2932_v46 = vpop.f32.mrb[13].mxu0 }
 0x85f   : > { %v2127_v47 = vpop.f32.mrb[14].mxu0 }
 0x860   : > { %v2933_v48 = vpop.f32.mrb[15].mxu0  ;;  %2934 = vmatprep.subr.msk.mxu1 %vm1369_vm5, %v2125_v45 }
 0x8e8   : > { %v1937_v7 = vpop.xlane.xlu0 %1936 }
 0x8e9   : > { %v1939_v38 = vmul.f32 0.03125, %v1937_v7 }
 0x8eb   : > { %v1940_v39 = vsub.f32 %v1931_v35, %v1939_v38 }
 0x8ed   : > { %v1941_v40 = vmul.f32 %v1940_v39, %v1940_v39 }
 0x8ef   : > { %v1942_v41 = vsel %vm1934_vm9, %v1941_v40, 0.0 }
 0x8f0   : > { %1943 = vadd.xlane.f32.xlu0 %v1942_v41  ;;  %v2781_v41 = vld [vmem:[%s4054_s29 + $0x1] ss:$0 sm:$0xff] }
 0x97d   : > { %v1944_v49 = vpop.xlane.xlu0 %1943 }
 0x97e   : > { %v1945_v50 = vmul.f32 0.03125, %v1944_v49 }
 0x980   : > { %v1946_v51 = vadd.f32 1e-05, %v1945_v50 }
 0x982   : > { %3072 = vrsqrt.f32 %v1946_v51 }
 0x98c   : > { %v3073_v52 = vpop.eup %3072 }
 0x98d   : > { %v1948_v54 = vmul.f32 %v3073_v52, %v1940_v39 }
 0x98f   : > { %v1955_v56 = vmul.f32 %v2756_v53, %v1948_v54 }
 0x991   : > { %v1962_v57 = vadd.f32 %v2757_v55, %v1955_v56 }
 0x993   : > { %v1968_v58 = vpack.c.bf16 %v1962_v57, %v1962_v57 }
 0x995   : > { %2923 = vmatmul.mubr.msk.bf16.vlgmr.msra.gmra.mrb[16].mxu1 %vm1186_vm3, %v1968_v58 }
 0x996   : > { %2935 = vmatpush3.msk.msra.mxu1 %vm1369_vm5, %v2125_v45  ;;  %2936 = vmatprep.mubr.msk.f32.mxu1 %vm1362_vm4, %v4120_v13  ;;  %v2758_v13 = vld [vmem:[%s4054_s29] ss:$0 sm:$0xff] }
 0x99d   : > { %2937 = vmatmul.mubr.msk.f32.vlgmr.msra.gmra.mrb[20].mxu1 %vm1362_vm4, %v4141_v24 }
 0xa68   : > { %v2024_v59 = vpop.f32.mrb[16].mxu1 }
 0xa69   : > { %v2924_v60 = vpop.f32.mrb[17].mxu1  ;;  %v2025_v9 = vadd.f32 %v2758_v13, %v2024_v59 }
 0xa6a   : > { %v2027_v61 = vpop.f32.mrb[18].mxu1 }
 0xa6b   : > { %v2925_v62 = vpop.f32.mrb[19].mxu1 }
 0xa70   : > { %v2938_v63 = vpop.f32.mrb[20].mxu1 }
 0xa71   : > { %v2199_v0 = vpop.f32.mrb[21].mxu1  ;;  %v2209_v2 = vadd.f32 %v2938_v63, %v4107_v11  ;;  %v2030_v11 = vadd.f32 %v2025_v9, %v1962_v57 }
 0xa72   : > { %v2208_v1 = vadd.f32 %v2199_v0, %v4102_v10 }
 0xa73   : > { %v2217_v5 = vsel %vm1186_vm3, %v2209_v2, 0.0  ;;  %v2033_v19 = vsel %vm1934_vm9, %v2030_v11, 0.0 }
 0xa74   : > { %v2214_v3 = vsel %vm1186_vm3, %v2208_v1, 0.0 }
 0xa75   : > { %2215 = vadd.xlane.f32.xlu1 %v2214_v3 }
 0xa79   : > { %2218 = vadd.xlane.f32.xlu1 %v2217_v5  ;;  %v2762_v5 = vld [vmem:[%s4022_s11] ss:$0 sm:$0xff] }
 0xb02   : > { %v2216_v8 = vpop.xlane.xlu1 %2215 }
 0xb03   : > { %v2220_v24 = vmul.f32 0.03125, %v2216_v8  ;;  %v2763_v8 = vld [vmem:[%s4025_s28] ss:$0 sm:$0xff] }
 0xb05   : > { %v2222_v12 = vsub.f32 %v2208_v1, %v2220_v24 }
 0xb06   : > { %v2219_v14 = vpop.xlane.xlu1 %2218 }
 0xb07   : > { %v2221_v15 = vmul.f32 0.03125, %v2219_v14  ;;  %v2224_v16 = vmul.f32 %v2222_v12, %v2222_v12 }
 0xb09   : > { %v2223_v17 = vsub.f32 %v2209_v2, %v2221_v15  ;;  %v2226_v10 = vsel %vm1186_vm3, %v2224_v16, 0.0 }
 0xb0a   : > { %2227 = vadd.xlane.f32.xlu0 %v2226_v10 }
 0xb0b   : > { %v2225_v18 = vmul.f32 %v2223_v17, %v2223_v17 }
 0xb0d   : > { %v2229_v20 = vsel %vm1186_vm3, %v2225_v18, 0.0 }
 0xb0e   : > { %2034 = vadd.xlane.f32.xlu0 %v2033_v19  ;;  %2230 = vadd.xlane.f32.xlu1 %v2229_v20 }
 0xb97   : > { %v2228_v23 = vpop.xlane.xlu0 %2227 }
 0xb98   : > { %v2232_v25 = vmul.f32 0.03125, %v2228_v23  ;;  %v2787_v23 = vld [vmem:[%s4022_s11 + $0x1] ss:$0 sm:$0xff] }
 0xb9a   : > { %v2234_v26 = vadd.f32 1e-05, %v2232_v25 }
 0xb9b   : > { %v2231_v27 = vpop.xlane.xlu1 %2230  ;;  %v2035_v39 = vpop.xlane.xlu0 %2034 }
 0xb9c   : > { %3074 = vrsqrt.f32 %v2234_v26  ;;  %v2233_v28 = vmul.f32 0.03125, %v2231_v27  ;;  %v2036_v40 = vmul.f32 0.03125, %v2035_v39  ;;  %v2788_v27 = vld [vmem:[%s4025_s28 + $0x1] ss:$0 sm:$0xff] }
 0xb9e   : > { %v2235_v29 = vadd.f32 1e-05, %v2233_v28  ;;  %v2037_v43 = vsub.f32 %v2030_v11, %v2036_v40 }
 0xba0   : > { %3076 = vrsqrt.f32 %v2235_v29  ;;  %v2038_v51 = vmul.f32 %v2037_v43, %v2037_v43 }
 0xba2   : > { %v2039_v53 = vsel %vm1934_vm9, %v2038_v51, 0.0 }
 0xba6   : > { %v3075_v30 = vpop.eup %3074 }
 0xba7   : > { %v2238_v31 = vmul.f32 %v3075_v30, %v2222_v12 }
 0xba9   : > { %v2246_v34 = vmul.f32 %v2774_v32, %v2238_v31 }
 0xbaa   : > { %v3077_v33 = vpop.eup %3076 }
 0xbab   : > { %v2239_v35 = vmul.f32 %v3077_v33, %v2223_v17  ;;  %v2254_v37 = vadd.f32 %v2775_v36, %v2246_v34 }
 0xbad   : > { %v2247_v4 = vmul.f32 %v2774_v32, %v2239_v35 }
 0xbaf   : > { %v2255_v7 = vadd.f32 %v2775_v36, %v2247_v4 }
 0xbb1   : > { %v2263_v38 = vpack.c.bf16 %v2255_v7, %v2254_v37 }
 0xbb3   : > { %2944 = vmatmul.mubr.msk.bf16.vlgmr.msra.gmra.mrb[16].mxu0 %vm1186_vm3, %v2263_v38 }
 0xc86   : > { %v2319_v42 = vpop.f32.mrb[16].mxu0 }
 0xc87   : > { %v2320_v6 = vadd.f32 %v2781_v41, %v2319_v42  ;;  %v2945_v44 = vpop.f32.mrb[17].mxu0 }
 0xc88   : > { %v2322_v45 = vpop.f32.mrb[18].mxu0 }
 0xc89   : > { %v2323_v46 = vadd.f32 %v2781_v41, %v2322_v45  ;;  %v2946_v47 = vpop.f32.mrb[19].mxu0  ;;  %v2326_v48 = vadd.f32 %v2320_v6, %v2254_v37 }
 0xc8b   : > { %v2332_v49 = vsel %vm1186_vm3, %v2326_v48, 0.0  ;;  %v2327_v50 = vadd.f32 %v2323_v46, %v2255_v7 }
 0xc8c   : > { %2333 = vadd.xlane.f32.xlu1 %v2332_v49 }
 0xc8d   : > { %v2335_v52 = vsel %vm1186_vm3, %v2327_v50, 0.0 }
 0xc8e   : > { %2336 = vadd.xlane.f32.xlu0 %v2335_v52 }
 0xc90   : > { %2040 = vadd.xlane.f32.xlu1 %v2039_v53 }
 0xd19   : > { %v2334_v54 = vpop.xlane.xlu1 %2333 }
 0xd1a   : > { %v2338_v55 = vmul.f32 0.03125, %v2334_v54 }
 0xd1b   : > { %v2337_v56 = vpop.xlane.xlu0 %2336 }
 0xd1c   : > { %v2340_v57 = vsub.f32 %v2326_v48, %v2338_v55  ;;  %v2339_v58 = vmul.f32 0.03125, %v2337_v56 }
 0xd1d   : > { %v2041_v59 = vpop.xlane.xlu1 %2040 }
 0xd1e   : > { %v2341_v60 = vsub.f32 %v2327_v50, %v2339_v58  ;;  %v2042_v61 = vmul.f32 0.03125, %v2041_v59  ;;  %v2342_v62 = vmul.f32 %v2340_v57, %v2340_v57 }
 0xd20   : > { %v2043_v63 = vadd.f32 1e-05, %v2042_v61  ;;  %v2344_v0 = vsel %vm1186_vm3, %v2342_v62, 0.0  ;;  %v2343_v1 = vmul.f32 %v2341_v60, %v2341_v60 }
 0xd21   : > { %2345 = vadd.xlane.f32.xlu0 %v2344_v0 }
 0xd22   : > { %3078 = vrsqrt.f32 %v2043_v63  ;;  %v2347_v2 = vsel %vm1186_vm3, %v2343_v1, 0.0 }
 0xd23   : > { %2348 = vadd.xlane.f32.xlu1 %v2347_v2 }
 0xd2c   : > { %v3079_v3 = vpop.eup %3078 }
 0xd2d   : > { %v2045_v13 = vmul.f32 %v3079_v3, %v2037_v43 }
 0xd2f   : > { %v2052_v24 = vmul.f32 %v2762_v5, %v2045_v13 }
 0xd31   : > { %v2059_v9 = vadd.f32 %v2763_v8, %v2052_v24 }
 0xd33   : > { %v2764_v12 = vmul.f32 -1.442695, %v2059_v9 }
 0xd35   : > { %3080 = vpow2.f32 %v2764_v12 }
 0xd3f   : > { %v3081_v14 = vpop.eup %3080 }
 0xd40   : > { %v2063_v15 = vadd.f32 1.0, %v3081_v14 }
 0xd42   : > { %3082 = vrcp.f32 %v2063_v15 }
 0xd4c   : > { %v3083_v16 = vpop.eup %3082 }
 0xd4d   : > { %v2066_v17 = vmul.f32 %v3083_v16, %v2059_v9 }
 0xd4f   : > { %2388 = vst.msk [vmem:[%s4377_s25] sm:$0x3] %vm1934_vm9, %v2066_v17 }
 0xdae   : > { %v2346_v10 = vpop.xlane.xlu0 %2345 }
 0xdaf   : > { %v2350_v11 = vmul.f32 0.03125, %v2346_v10 }
 0xdb0   : > { %v2349_v18 = vpop.xlane.xlu1 %2348 }
 0xdb1   : > { %v2352_v19 = vadd.f32 1e-05, %v2350_v11  ;;  %v2351_v20 = vmul.f32 0.03125, %v2349_v18 }
 0xdb3   : > { %3084 = vrsqrt.f32 %v2352_v19  ;;  %v2353_v21 = vadd.f32 1e-05, %v2351_v20 }
 0xdb5   : > { %3086 = vrsqrt.f32 %v2353_v21 }
 0xdbd   : > { %v3085_v22 = vpop.eup %3084 }
 0xdbe   : > { %v2356_v25 = vmul.f32 %v3085_v22, %v2340_v57 }
 0xdbf   : > { %v3087_v26 = vpop.eup %3086 }
 0xdc0   : > { %v2364_v28 = vmul.f32 %v2787_v23, %v2356_v25  ;;  %v2357_v29 = vmul.f32 %v3087_v26, %v2341_v60 }
 0xdc2   : > { %v2372_v30 = vadd.f32 %v2788_v27, %v2364_v28  ;;  %v2365_v31 = vmul.f32 %v2787_v23, %v2357_v29 }
 0xdc4   : > { %v2789_v32 = vmul.f32 -1.442695, %v2372_v30  ;;  %v2373_v33 = vadd.f32 %v2788_v27, %v2365_v31 }
 0xdc6   : > { %3088 = vpow2.f32 %v2789_v32  ;;  %v2790_v34 = vmul.f32 -1.442695, %v2373_v33 }
 0xdc8   : > { %3090 = vpow2.f32 %v2790_v34 }
 0xdd0   : > { %v3089_v35 = vpop.eup %3088 }
 0xdd1   : > { %v2380_v36 = vadd.f32 1.0, %v3089_v35 }
 0xdd2   : > { %v3091_v4 = vpop.eup %3090 }
 0xdd3   : > { %3092 = vrcp.f32 %v2380_v36  ;;  %v2381_v37 = vadd.f32 1.0, %v3091_v4 }
 0xdd5   : > { %3094 = vrcp.f32 %v2381_v37 }
 0xddd   : > { %v3093_v7 = vpop.eup %3092 }
 0xdde   : > { %v2386_v38 = vmul.f32 %v3093_v7, %v2372_v30 }
 0xddf   : > { %v3095_v39 = vpop.eup %3094 }
 0xde0   : > { %2389 = vst.msk [vmem:[%s4378_s6] sm:$0xff] %vm1186_vm3, %v2386_v38  ;;  %v2387_v40 = vmul.f32 %v3095_v39, %v2373_v33 }
 0xde2   : > { %2390 = vst.msk [vmem:[%s4378_s6 + $0x8] sm:$0xff] %vm1186_vm3, %v2387_v40 }
 0xde3 PF: > { %s4394_s25 = sld [smem:[#allocation25_spill]]  ;;  %s4395_s3 = sld [smem:[#allocation24_spill]] }
 0xde4   : > { %s4396_s24 = sld [smem:[#allocation26_spill]]  ;;  %s4397_s4 = smov %s3442_s30 }
 0xde9   : > { %p49_p2 = scmp.ge.s32.totalorder %s4394_s25, 4   ;;  %s4398_s30 = smov %s4395_s3 }
 0xdeb   :  { %51 = sbr.rel (!%p49_p2) target bundleno = 34 (0x22), region = 289 }
 0xdf2   :  { %2408 = vsyncpa [#allocation3], 1 }
 0xdf3   :  { %2410 = vsyncpa [#allocation3 + $0x1], 1 }
 0xdf4   :  { %2411 = vsyncpa [#allocation5], 1 }
 0xdf5   :  { %2413 = vsyncpa [#allocation5 + $0x1], 1 }
 0xdf6   :  { %2414 = vsyncpa [#allocation8], 1 }
 0xdf7   :  { %2416 = vsyncpa [#allocation8 + $0x1], 1 }
 0xdf8   :  { %2417 = vsyncpa [#allocation11], 1 }
 0xdf9   :  { %2419 = vsyncpa [#allocation11 + $0x1], 1 }
 0xdfa   :  { %2420 = vsyncpa [#allocation14], 1 }
 0xdfb   :  { %2422 = vsyncpa [#allocation14 + $0x1], 1 }
 0xdfc   :  { %2423 = vsyncpa [#allocation17], 1 }
 0xdfd   :  { %2425 = vsyncpa [#allocation17 + $0x1], 1 }

</bundles_post_ra>
